<compile_context>
chip_gen: v6e
topology: v6e:2x2x1
jax: 0.10.0
libtpu: 0.0.40
codegen_flags: <defaults>
</compile_context>

<pallas_src>
import functools

import jax
import jax.numpy as jnp
import numpy as np
from jax import lax
from jax.experimental import pallas as pl
from jax.experimental.pallas import tpu as pltpu


# ----------------------------------------------------------------------------
# Fused kernel: expand(1x1) -> depthwise(3x3) -> project(1x1) (+ residual)
# Operates on one batch element: x_ref is (Cin, P) with P = H*W on the lanes.
# ----------------------------------------------------------------------------
def _fused_ir_kernel(x_ref, w1_ref, s1_ref, b1_ref,
                     w2_ref, s2_ref, b2_ref,
                     w3_ref, s3_ref, b3_ref,
                     o_ref, h1p_ref, *, H, W, lpad, rpad, use_res):
    P = H * W
    x = x_ref[...].astype(jnp.float32)        # (Cin, P)  spatial on lanes
    w1 = w1_ref[...].astype(jnp.float32)      # (Chid, Cin)
    w2 = w2_ref[...].astype(jnp.float32)      # (Chid, 9), row = ky*3 + kx
    w3 = w3_ref[...].astype(jnp.float32)      # (Cout, Chid)
    cin = x.shape[0]
    chid = w1.shape[0]

    # ---- stage 1: 1x1 expand + BN + ReLU (VPU broadcast-MAC, tiny K=Cin) ----
    terms = [w1[:, c:c + 1] * x[c:c + 1, :] for c in range(cin)]
    while len(terms) > 1:                      # tree reduce, no serial dep chain
        nxt = [terms[i] + terms[i + 1] for i in range(0, len(terms) - 1, 2)]
        if len(terms) % 2:
            nxt.append(terms[-1])
        terms = nxt
    h1 = jnp.maximum(terms[0] * s1_ref[...] + b1_ref[...], 0.0)   # (Chid, P)

    # ---- stage 2: 3x3 depthwise (pad=1) + BN + ReLU --------------------------
    # h1 goes into a VMEM scratch with a zero halo on both sides of the
    # flattened spatial axis; the 9 taps are static lane-shifted slices of it.
    # The zero halo supplies the top/bottom padding rows; left/right padding
    # columns are enforced with one select per +-dx tap group.
    # Only the halo strips are zeroed (interior is overwritten every step);
    # zeroing every step keeps per-core scratch correct under megacore sharding.
    h1p_ref[:, 0:lpad] = jnp.zeros((chid, lpad), jnp.float32)
    h1p_ref[:, lpad + P:lpad + P + rpad] = jnp.zeros((chid, rpad), jnp.float32)
    h1p_ref[:, lpad:lpad + P] = h1             # lane-aligned store (lpad % 128 == 0)

    col = lax.broadcasted_iota(jnp.int32, (1, P), 1) % W
    not_first_col = col > 0                    # x-1 is a valid column
    not_last_col = col < (W - 1)               # x+1 is a valid column

    def tap(off):                              # tap(off)[c, p] == h1_padded[c, p + off]
        return h1p_ref[:, lpad + off:lpad + off + P]

    # dx = 0 group (kernel taps 1, 4, 7): no column mask needed.
    acc = (w2[:, 1:2] * tap(-W) + w2[:, 4:5] * tap(0) + w2[:, 7:8] * tap(W))
    # dx = -1 group (taps 0, 3, 6): one select for the whole group.
    g = (w2[:, 0:1] * tap(-W - 1) + w2[:, 3:4] * tap(-1) + w2[:, 6:7] * tap(W - 1))
    acc = acc + jnp.where(not_first_col, g, 0.0)
    # dx = +1 group (taps 2, 5, 8): one select for the whole group.
    g = (w2[:, 2:3] * tap(-W + 1) + w2[:, 5:6] * tap(1) + w2[:, 8:9] * tap(W + 1))
    acc = acc + jnp.where(not_last_col, g, 0.0)
    h2 = jnp.maximum(acc * s2_ref[...] + b2_ref[...], 0.0)        # (Chid, P)

    # ---- stage 3: 1x1 project + BN (no act) + fused residual -----------------
    # K = Chid (24): run on the otherwise-idle MXU instead of a serial VALU chain.
    y = jnp.dot(w3, h2, preferred_element_type=jnp.float32)       # (Cout, P)
    y = y * s3_ref[...] + b3_ref[...]
    if use_res:
        y = y + x                                                 # Cin == Cout
    o_ref[...] = y.astype(o_ref.dtype)


# ----------------------------------------------------------------------------
# InvertedResidual forward (NCHW in / NCHW out, matching PyTorch)
# ----------------------------------------------------------------------------
def inverted_residual(x_nchw, params, stride):
    N, Cin, H, W = x_nchw.shape
    P = H * W

    w1t = jnp.transpose(params["w1"])                  # (Chid, Cin)
    w2f = jnp.transpose(params["w2"].reshape(9, -1))   # (Chid, 9), row = ky*3+kx
    w3t = jnp.transpose(params["w3"])                  # (Cout, Chid)
    Chid = w1t.shape[0]
    Cout = w3t.shape[0]
    col = lambda v: v.reshape(-1, 1)
    s1, b1 = col(params["s1"]), col(params["b1"])
    s2, b2 = col(params["s2"]), col(params["b2"])
    s3, b3 = col(params["s3"]), col(params["b3"])

    # Halo covering the +-(W+1) flattened depthwise tap offsets.  Left pad is a
    # multiple of 128 so the interior store is lane-aligned; the right pad only
    # needs W+1 lanes (rounded to 8).
    lpad = 128 * pl.cdiv(W + 1, 128)
    rpad = 8 * pl.cdiv(W + 1, 8)

    use_res = stride == 1 and Cin == Cout
    kernel = functools.partial(_fused_ir_kernel, H=H, W=W, lpad=lpad, rpad=rpad,
                               use_res=use_res)

    wspec = lambda r, c: pl.BlockSpec((r, c), lambda b: (0, 0))
    # TODO(synk): for production FastSCNN resolutions, add a row-tile grid axis
    # (1-row halo) so the (Chid, lpad+P+rpad) scratch stays within v7x's 64 MiB
    # VMEM, and fold stride>1 into the tap offsets so stages 2-3 and the output
    # writeback run at the subsampled resolution; at the shapes exercised here
    # the scratch is ~48 KiB and the tested block is stride=1.
    out = pl.pallas_call(
        kernel,
        out_shape=jax.ShapeDtypeStruct((N, Cout, P), x_nchw.dtype),
        grid_spec=pltpu.PrefetchScalarGridSpec(
            num_scalar_prefetch=0,
            grid=(N,),
            in_specs=[
                pl.BlockSpec((None, Cin, P), lambda b: (b, 0, 0)),
                wspec(Chid, Cin), wspec(Chid, 1), wspec(Chid, 1),
                wspec(Chid, 9), wspec(Chid, 1), wspec(Chid, 1),
                wspec(Cout, Chid), wspec(Cout, 1), wspec(Cout, 1),
            ],
            out_specs=pl.BlockSpec((None, Cout, P), lambda b: (b, 0, 0)),
            scratch_shapes=[pltpu.VMEM((Chid, lpad + P + rpad), jnp.float32)],
        ),
        compiler_params=pltpu.CompilerParams(dimension_semantics=("parallel",)),
    )(x_nchw.reshape(N, Cin, P), w1t, s1, b1, w2f, s2, b2, w3t, s3, b3)

    out = out.reshape(N, Cout, H, W)
    if stride > 1:
        # stride-s 3x3 conv (pad=1) == subsampled stride-1 output; residual is
        # disabled by construction when stride > 1.
        out = out[:, :, ::stride, ::stride]
    return out


# ----------------------------------------------------------------------------
# Pure-JAX reference (lax convs) for validation
# ----------------------------------------------------------------------------
def reference(x_nchw, params, stride):
    Cin = x_nchw.shape[1]
    Cout = params["w3"].shape[1]
    use_res = stride == 1 and Cin == Cout
    x = jnp.transpose(x_nchw, (0, 2, 3, 1))
    dn = ("NHWC", "HWIO", "NHWC")
    h = lax.conv_general_dilated(x, params["w1"][None, None], (1, 1), "VALID",
                                 dimension_numbers=dn)
    h = jnp.maximum(h * params["s1"] + params["b1"], 0.0)
    wdw = params["w2"][:, :, None, :]  # (3,3,1,C) grouped
    h = lax.conv_general_dilated(h, wdw, (stride, stride), ((1, 1), (1, 1)),
                                 dimension_numbers=dn,
                                 feature_group_count=h.shape[-1])
    h = jnp.maximum(h * params["s2"] + params["b2"], 0.0)
    h = lax.conv_general_dilated(h, params["w3"][None, None], (1, 1), "VALID",
                                 dimension_numbers=dn)
    h = h * params["s3"] + params["b3"]
    out = h + x if use_res else h
    return jnp.transpose(out, (0, 3, 1, 2))


if __name__ == "__main__":
    key = jax.random.PRNGKey(0)

    def make_params(pkey, Cin, Cout, expand):
        Chid = int(round(Cin * expand))
        keys = jax.random.split(pkey, 15)

        def bn_fold(kg, kb, km, kv, C):
            gamma = 1.0 + 0.1 * jax.random.normal(kg, (C,), jnp.float32)
            beta = 0.1 * jax.random.normal(kb, (C,), jnp.float32)
            mean = 0.1 * jax.random.normal(km, (C,), jnp.float32)
            var = jnp.abs(jax.random.normal(kv, (C,), jnp.float32)) + 0.5
            scale = gamma / jnp.sqrt(var + 1e-5)
            bias = beta - mean * scale
            return scale, bias

        w1 = 0.3 * jax.random.normal(keys[0], (Cin, Chid), jnp.float32)   # 1x1 expand
        w2 = 0.3 * jax.random.normal(keys[1], (3, 3, Chid), jnp.float32)  # 3x3 depthwise
        w3 = 0.3 * jax.random.normal(keys[2], (Chid, Cout), jnp.float32)  # 1x1 project
        s1, b1 = bn_fold(keys[3], keys[4], keys[5], keys[6], Chid)
        s2, b2 = bn_fold(keys[7], keys[8], keys[9], keys[10], Chid)
        s3, b3 = bn_fold(keys[11], keys[12], keys[13], keys[14], Cout)
        return dict(w1=w1, s1=s1, b1=b1, w2=w2, s2=s2, b2=b2, w3=w3, s3=s3, b3=b3)

    N, H, W = 2, 16, 16
    kx, kp1, kp2 = jax.random.split(key, 3)
    x = jax.random.normal(kx, (N, 4, H, W), jnp.float32)

    # Config 1: InvertedResidual(in=4, out=4, stride=1, expand_ratio=6) -> residual on.
    p1 = make_params(kp1, 4, 4, 6)
    out1 = jax.block_until_ready(inverted_residual(x, p1, stride=1))
    np.testing.assert_allclose(np.asarray(out1), np.asarray(reference(x, p1, 1)),
                               rtol=1e-4, atol=1e-4)

    # Config 2: InvertedResidual(in=4, out=8, stride=2, expand_ratio=6) -> no residual.
    p2 = make_params(kp2, 4, 8, 6)
    out2 = jax.block_until_ready(inverted_residual(x, p2, stride=2))
    np.testing.assert_allclose(np.asarray(out2), np.asarray(reference(x, p2, 2)),
                               rtol=1e-4, atol=1e-4)

    print("KERNEL_OK")
</pallas_src>

<mosaic_0001>
module attributes {stable_mosaic.version = 11 : i64} {
  func.func @_fused_ir_kernel(%arg0: i32, %arg1: memref<1x4x256xf32, #tpu.memory_space<vmem>>, %arg2: memref<24x4xf32, #tpu.memory_space<vmem>>, %arg3: memref<24x1xf32, #tpu.memory_space<vmem>>, %arg4: memref<24x1xf32, #tpu.memory_space<vmem>>, %arg5: memref<24x9xf32, #tpu.memory_space<vmem>>, %arg6: memref<24x1xf32, #tpu.memory_space<vmem>>, %arg7: memref<24x1xf32, #tpu.memory_space<vmem>>, %arg8: memref<4x24xf32, #tpu.memory_space<vmem>>, %arg9: memref<4x1xf32, #tpu.memory_space<vmem>>, %arg10: memref<4x1xf32, #tpu.memory_space<vmem>>, %arg11: memref<1x4x256xf32, #tpu.memory_space<vmem>>, %arg12: memref<24x408xf32, #tpu.memory_space<vmem>>) attributes {dimension_semantics = [#tpu.dimension_semantics<parallel>], iteration_bounds = array<i64: 2>, scalar_prefetch = 0 : i64, scratch_operands = 1 : i64, tpu.core_type = #tpu.core_type<tc>, window_params = [{transform_indices = @transform_0, window_bounds = array<i64: 1, 4, 256>}, {pipeline_mode = #tpu.pipeline_mode<synchronous>, transform_indices = @transform_1, window_bounds = array<i64: 24, 4>}, {pipeline_mode = #tpu.pipeline_mode<synchronous>, transform_indices = @transform_2, window_bounds = array<i64: 24, 1>}, {pipeline_mode = #tpu.pipeline_mode<synchronous>, transform_indices = @transform_3, window_bounds = array<i64: 24, 1>}, {pipeline_mode = #tpu.pipeline_mode<synchronous>, transform_indices = @transform_4, window_bounds = array<i64: 24, 9>}, {pipeline_mode = #tpu.pipeline_mode<synchronous>, transform_indices = @transform_5, window_bounds = array<i64: 24, 1>}, {pipeline_mode = #tpu.pipeline_mode<synchronous>, transform_indices = @transform_6, window_bounds = array<i64: 24, 1>}, {pipeline_mode = #tpu.pipeline_mode<synchronous>, transform_indices = @transform_7, window_bounds = array<i64: 4, 24>}, {pipeline_mode = #tpu.pipeline_mode<synchronous>, transform_indices = @transform_8, window_bounds = array<i64: 4, 1>}, {pipeline_mode = #tpu.pipeline_mode<synchronous>, transform_indices = @transform_9, window_bounds = array<i64: 4, 1>}, {transform_indices = @transform_10, window_bounds = array<i64: 1, 4, 256>}]} {
    %c0 = arith.constant 0 : index
    %c0_0 = arith.constant 0 : index
    %c0_1 = arith.constant 0 : index
    %0 = vector.load %arg1[%c0, %c0_0, %c0_1] : memref<1x4x256xf32, #tpu.memory_space<vmem>>, vector<1x4x256xf32>
    %1 = vector.shape_cast %0 : vector<1x4x256xf32> to vector<4x256xf32>
    %c0_2 = arith.constant 0 : index
    %c0_3 = arith.constant 0 : index
    %2 = vector.load %arg2[%c0_2, %c0_3] : memref<24x4xf32, #tpu.memory_space<vmem>>, vector<24x4xf32>
    %c0_4 = arith.constant 0 : index
    %c0_5 = arith.constant 0 : index
    %3 = vector.load %arg5[%c0_4, %c0_5] : memref<24x9xf32, #tpu.memory_space<vmem>>, vector<24x9xf32>
    %c0_6 = arith.constant 0 : index
    %c0_7 = arith.constant 0 : index
    %4 = vector.load %arg8[%c0_6, %c0_7] : memref<4x24xf32, #tpu.memory_space<vmem>>, vector<4x24xf32>
    %5 = vector.extract_strided_slice %2 {offsets = [0, 0], sizes = [24, 1], strides = [1, 1]} : vector<24x4xf32> to vector<24x1xf32>
    %6 = vector.extract_strided_slice %1 {offsets = [0, 0], sizes = [1, 256], strides = [1, 1]} : vector<4x256xf32> to vector<1x256xf32>
    %7 = vector.broadcast %5 : vector<24x1xf32> to vector<24x256xf32>
    %8 = vector.broadcast %6 : vector<1x256xf32> to vector<24x256xf32>
    %9 = arith.mulf %7, %8 : vector<24x256xf32>
    %10 = vector.extract_strided_slice %2 {offsets = [0, 1], sizes = [24, 1], strides = [1, 1]} : vector<24x4xf32> to vector<24x1xf32>
    %11 = vector.extract_strided_slice %1 {offsets = [1, 0], sizes = [1, 256], strides = [1, 1]} : vector<4x256xf32> to vector<1x256xf32>
    %12 = vector.broadcast %10 : vector<24x1xf32> to vector<24x256xf32>
    %13 = vector.broadcast %11 : vector<1x256xf32> to vector<24x256xf32>
    %14 = arith.mulf %12, %13 : vector<24x256xf32>
    %15 = vector.extract_strided_slice %2 {offsets = [0, 2], sizes = [24, 1], strides = [1, 1]} : vector<24x4xf32> to vector<24x1xf32>
    %16 = vector.extract_strided_slice %1 {offsets = [2, 0], sizes = [1, 256], strides = [1, 1]} : vector<4x256xf32> to vector<1x256xf32>
    %17 = vector.broadcast %15 : vector<24x1xf32> to vector<24x256xf32>
    %18 = vector.broadcast %16 : vector<1x256xf32> to vector<24x256xf32>
    %19 = arith.mulf %17, %18 : vector<24x256xf32>
    %20 = vector.extract_strided_slice %2 {offsets = [0, 3], sizes = [24, 1], strides = [1, 1]} : vector<24x4xf32> to vector<24x1xf32>
    %21 = vector.extract_strided_slice %1 {offsets = [3, 0], sizes = [1, 256], strides = [1, 1]} : vector<4x256xf32> to vector<1x256xf32>
    %22 = vector.broadcast %20 : vector<24x1xf32> to vector<24x256xf32>
    %23 = vector.broadcast %21 : vector<1x256xf32> to vector<24x256xf32>
    %24 = arith.mulf %22, %23 : vector<24x256xf32>
    %25 = arith.addf %9, %14 : vector<24x256xf32>
    %26 = arith.addf %19, %24 : vector<24x256xf32>
    %27 = arith.addf %25, %26 : vector<24x256xf32>
    %c0_8 = arith.constant 0 : index
    %c0_9 = arith.constant 0 : index
    %28 = vector.load %arg3[%c0_8, %c0_9] : memref<24x1xf32, #tpu.memory_space<vmem>>, vector<24x1xf32>
    %29 = vector.broadcast %28 : vector<24x1xf32> to vector<24x256xf32>
    %30 = arith.mulf %27, %29 : vector<24x256xf32>
    %c0_10 = arith.constant 0 : index
    %c0_11 = arith.constant 0 : index
    %31 = vector.load %arg4[%c0_10, %c0_11] : memref<24x1xf32, #tpu.memory_space<vmem>>, vector<24x1xf32>
    %32 = vector.broadcast %31 : vector<24x1xf32> to vector<24x256xf32>
    %33 = arith.addf %30, %32 : vector<24x256xf32>
    %cst = arith.constant 0.000000e+00 : f32
    %34 = vector.broadcast %cst : f32 to vector<24x256xf32>
    %35 = arith.maximumf %33, %34 : vector<24x256xf32>
    %cst_12 = arith.constant 0.000000e+00 : f32
    %36 = vector.broadcast %cst_12 : f32 to vector<24x128xf32>
    %c0_13 = arith.constant 0 : index
    %c0_14 = arith.constant 0 : index
    %37 = vector.load %arg12[%c0_13, %c0_14] : memref<24x408xf32, #tpu.memory_space<vmem>>, vector<24x128xf32>
    tpu.vector_store %arg12[%c0_13, %c0_14], %36 {strides = array<i32>} : memref<24x408xf32, #tpu.memory_space<vmem>>, vector<24x128xf32>,
    %cst_15 = arith.constant 0.000000e+00 : f32
    %38 = vector.broadcast %cst_15 : f32 to vector<24x24xf32>
    %c0_16 = arith.constant 0 : index
    %c384 = arith.constant 384 : index
    %39 = vector.load %arg12[%c0_16, %c384] : memref<24x408xf32, #tpu.memory_space<vmem>>, vector<24x24xf32>
    tpu.vector_store %arg12[%c0_16, %c384], %38 {strides = array<i32>} : memref<24x408xf32, #tpu.memory_space<vmem>>, vector<24x24xf32>,
    %c0_17 = arith.constant 0 : index
    %c128 = arith.constant 128 : index
    %40 = vector.load %arg12[%c0_17, %c128] : memref<24x408xf32, #tpu.memory_space<vmem>>, vector<24x256xf32>
    tpu.vector_store %arg12[%c0_17, %c128], %35 {strides = array<i32>} : memref<24x408xf32, #tpu.memory_space<vmem>>, vector<24x256xf32>,
    %41 = tpu.iota {dimensions = array<i32: 1>} : vector<1x256xi32>
    %c16_i32 = arith.constant 16 : i32
    %c0_i32 = arith.constant 0 : i32
    %42 = arith.cmpi eq, %c16_i32, %c0_i32 : i32
    %c1_i32 = arith.constant 1 : i32
    %43 = arith.select %42, %c1_i32, %c16_i32 : i32
    %44 = vector.broadcast %43 : i32 to vector<1x256xi32>
    %45 = arith.remsi %41, %44 : vector<1x256xi32>
    %c0_i32_18 = arith.constant 0 : i32
    %46 = vector.broadcast %c0_i32_18 : i32 to vector<1x256xi32>
    %47 = arith.cmpi ne, %45, %46 : vector<1x256xi32>
    %c0_i32_19 = arith.constant 0 : i32
    %48 = vector.broadcast %c0_i32_19 : i32 to vector<1x256xi32>
    %49 = arith.cmpi slt, %45, %48 : vector<1x256xi32>
    %c0_i32_20 = arith.constant 0 : i32
    %50 = arith.cmpi slt, %43, %c0_i32_20 : i32
    %51 = vector.broadcast %50 : i1 to vector<1x256xi1>
    %52 = vector.broadcast %51 : vector<1x256xi1> to vector<1x256xi1>
    %53 = arith.xori %49, %52 : vector<1x256xi1>
    %54 = arith.andi %53, %47 : vector<1x256xi1>
    %55 = vector.broadcast %43 : i32 to vector<1x256xi32>
    %56 = arith.addi %45, %55 : vector<1x256xi32>
    %57 = arith.select %54, %56, %45 : vector<1x256xi1>, vector<1x256xi32>
    %c0_i32_21 = arith.constant 0 : i32
    %58 = vector.broadcast %c0_i32_21 : i32 to vector<1x256xi32>
    %59 = arith.cmpi sgt, %57, %58 : vector<1x256xi32>
    %c15_i32 = arith.constant 15 : i32
    %60 = vector.broadcast %c15_i32 : i32 to vector<1x256xi32>
    %61 = arith.cmpi slt, %57, %60 : vector<1x256xi32>
    %62 = vector.extract_strided_slice %3 {offsets = [0, 1], sizes = [24, 1], strides = [1, 1]} : vector<24x9xf32> to vector<24x1xf32>
    %c0_22 = arith.constant 0 : index
    %c112 = arith.constant 112 : index
    %63 = vector.load %arg12[%c0_22, %c112] : memref<24x408xf32, #tpu.memory_space<vmem>>, vector<24x256xf32>
    %64 = vector.broadcast %62 : vector<24x1xf32> to vector<24x256xf32>
    %65 = arith.mulf %64, %63 : vector<24x256xf32>
    %66 = vector.extract_strided_slice %3 {offsets = [0, 4], sizes = [24, 1], strides = [1, 1]} : vector<24x9xf32> to vector<24x1xf32>
    %c0_23 = arith.constant 0 : index
    %c128_24 = arith.constant 128 : index
    %67 = vector.load %arg12[%c0_23, %c128_24] : memref<24x408xf32, #tpu.memory_space<vmem>>, vector<24x256xf32>
    %68 = vector.broadcast %66 : vector<24x1xf32> to vector<24x256xf32>
    %69 = arith.mulf %68, %67 : vector<24x256xf32>
    %70 = arith.addf %65, %69 : vector<24x256xf32>
    %71 = vector.extract_strided_slice %3 {offsets = [0, 7], sizes = [24, 1], strides = [1, 1]} : vector<24x9xf32> to vector<24x1xf32>
    %c0_25 = arith.constant 0 : index
    %c144 = arith.constant 144 : index
    %72 = vector.load %arg12[%c0_25, %c144] : memref<24x408xf32, #tpu.memory_space<vmem>>, vector<24x256xf32>
    %73 = vector.broadcast %71 : vector<24x1xf32> to vector<24x256xf32>
    %74 = arith.mulf %73, %72 : vector<24x256xf32>
    %75 = arith.addf %70, %74 : vector<24x256xf32>
    %76 = vector.extract_strided_slice %3 {offsets = [0, 0], sizes = [24, 1], strides = [1, 1]} : vector<24x9xf32> to vector<24x1xf32>
    %c0_26 = arith.constant 0 : index
    %c111 = arith.constant 111 : index
    %77 = vector.load %arg12[%c0_26, %c111] : memref<24x408xf32, #tpu.memory_space<vmem>>, vector<24x256xf32>
    %78 = vector.broadcast %76 : vector<24x1xf32> to vector<24x256xf32>
    %79 = arith.mulf %78, %77 : vector<24x256xf32>
    %80 = vector.extract_strided_slice %3 {offsets = [0, 3], sizes = [24, 1], strides = [1, 1]} : vector<24x9xf32> to vector<24x1xf32>
    %c0_27 = arith.constant 0 : index
    %c127 = arith.constant 127 : index
    %81 = vector.load %arg12[%c0_27, %c127] : memref<24x408xf32, #tpu.memory_space<vmem>>, vector<24x256xf32>
    %82 = vector.broadcast %80 : vector<24x1xf32> to vector<24x256xf32>
    %83 = arith.mulf %82, %81 : vector<24x256xf32>
    %84 = arith.addf %79, %83 : vector<24x256xf32>
    %85 = vector.extract_strided_slice %3 {offsets = [0, 6], sizes = [24, 1], strides = [1, 1]} : vector<24x9xf32> to vector<24x1xf32>
    %c0_28 = arith.constant 0 : index
    %c143 = arith.constant 143 : index
    %86 = vector.load %arg12[%c0_28, %c143] : memref<24x408xf32, #tpu.memory_space<vmem>>, vector<24x256xf32>
    %87 = vector.broadcast %85 : vector<24x1xf32> to vector<24x256xf32>
    %88 = arith.mulf %87, %86 : vector<24x256xf32>
    %89 = arith.addf %84, %88 : vector<24x256xf32>
    %cst_29 = arith.constant 0.000000e+00 : f32
    %90 = vector.shape_cast %59 : vector<1x256xi1> to vector<1x256xi1>
    %91 = vector.broadcast %90 : vector<1x256xi1> to vector<24x256xi1>
    %92 = vector.broadcast %cst_29 : f32 to vector<24x256xf32>
    %93 = arith.select %91, %89, %92 : vector<24x256xi1>, vector<24x256xf32>
    %94 = arith.addf %75, %93 : vector<24x256xf32>
    %95 = vector.extract_strided_slice %3 {offsets = [0, 2], sizes = [24, 1], strides = [1, 1]} : vector<24x9xf32> to vector<24x1xf32>
    %c0_30 = arith.constant 0 : index
    %c113 = arith.constant 113 : index
    %96 = vector.load %arg12[%c0_30, %c113] : memref<24x408xf32, #tpu.memory_space<vmem>>, vector<24x256xf32>
    %97 = vector.broadcast %95 : vector<24x1xf32> to vector<24x256xf32>
    %98 = arith.mulf %97, %96 : vector<24x256xf32>
    %99 = vector.extract_strided_slice %3 {offsets = [0, 5], sizes = [24, 1], strides = [1, 1]} : vector<24x9xf32> to vector<24x1xf32>
    %c0_31 = arith.constant 0 : index
    %c129 = arith.constant 129 : index
    %100 = vector.load %arg12[%c0_31, %c129] : memref<24x408xf32, #tpu.memory_space<vmem>>, vector<24x256xf32>
    %101 = vector.broadcast %99 : vector<24x1xf32> to vector<24x256xf32>
    %102 = arith.mulf %101, %100 : vector<24x256xf32>
    %103 = arith.addf %98, %102 : vector<24x256xf32>
    %104 = vector.extract_strided_slice %3 {offsets = [0, 8], sizes = [24, 1], strides = [1, 1]} : vector<24x9xf32> to vector<24x1xf32>
    %c0_32 = arith.constant 0 : index
    %c145 = arith.constant 145 : index
    %105 = vector.load %arg12[%c0_32, %c145] : memref<24x408xf32, #tpu.memory_space<vmem>>, vector<24x256xf32>
    %106 = vector.broadcast %104 : vector<24x1xf32> to vector<24x256xf32>
    %107 = arith.mulf %106, %105 : vector<24x256xf32>
    %108 = arith.addf %103, %107 : vector<24x256xf32>
    %cst_33 = arith.constant 0.000000e+00 : f32
    %109 = vector.shape_cast %61 : vector<1x256xi1> to vector<1x256xi1>
    %110 = vector.broadcast %109 : vector<1x256xi1> to vector<24x256xi1>
    %111 = vector.broadcast %cst_33 : f32 to vector<24x256xf32>
    %112 = arith.select %110, %108, %111 : vector<24x256xi1>, vector<24x256xf32>
    %113 = arith.addf %94, %112 : vector<24x256xf32>
    %c0_34 = arith.constant 0 : index
    %c0_35 = arith.constant 0 : index
    %114 = vector.load %arg6[%c0_34, %c0_35] : memref<24x1xf32, #tpu.memory_space<vmem>>, vector<24x1xf32>
    %115 = vector.broadcast %114 : vector<24x1xf32> to vector<24x256xf32>
    %116 = arith.mulf %113, %115 : vector<24x256xf32>
    %c0_36 = arith.constant 0 : index
    %c0_37 = arith.constant 0 : index
    %117 = vector.load %arg7[%c0_36, %c0_37] : memref<24x1xf32, #tpu.memory_space<vmem>>, vector<24x1xf32>
    %118 = vector.broadcast %117 : vector<24x1xf32> to vector<24x256xf32>
    %119 = arith.addf %116, %118 : vector<24x256xf32>
    %cst_38 = arith.constant 0.000000e+00 : f32
    %120 = vector.broadcast %cst_38 : f32 to vector<24x256xf32>
    %121 = arith.maximumf %119, %120 : vector<24x256xf32>
    %cst_39 = arith.constant dense<0.000000e+00> : vector<4x256xf32>
    %122 = tpu.matmul %4, %121, %cst_39 {dimension_numbers = #tpu.dot_dimension_numbers<[1], [0], [0], [1], [0, 0, 1, 1], [], []>} : vector<4x24xf32>, vector<24x256xf32>, vector<4x256xf32> -> vector<4x256xf32>
    %c0_40 = arith.constant 0 : index
    %c0_41 = arith.constant 0 : index
    %123 = vector.load %arg9[%c0_40, %c0_41] : memref<4x1xf32, #tpu.memory_space<vmem>>, vector<4x1xf32>
    %124 = vector.broadcast %123 : vector<4x1xf32> to vector<4x256xf32>
    %125 = arith.mulf %122, %124 : vector<4x256xf32>
    %c0_42 = arith.constant 0 : index
    %c0_43 = arith.constant 0 : index
    %126 = vector.load %arg10[%c0_42, %c0_43] : memref<4x1xf32, #tpu.memory_space<vmem>>, vector<4x1xf32>
    %127 = vector.broadcast %126 : vector<4x1xf32> to vector<4x256xf32>
    %128 = arith.addf %125, %127 : vector<4x256xf32>
    %129 = arith.addf %128, %1 : vector<4x256xf32>
    %c0_44 = arith.constant 0 : index
    %c0_45 = arith.constant 0 : index
    %c0_46 = arith.constant 0 : index
    %130 = vector.load %arg11[%c0_44, %c0_45, %c0_46] : memref<1x4x256xf32, #tpu.memory_space<vmem>>, vector<1x4x256xf32>
    %131 = vector.shape_cast %130 : vector<1x4x256xf32> to vector<4x256xf32>
    %132 = vector.shape_cast %129 : vector<4x256xf32> to vector<1x4x256xf32>
    tpu.vector_store %arg11[%c0_44, %c0_45, %c0_46], %132 {strides = array<i32>} : memref<1x4x256xf32, #tpu.memory_space<vmem>>, vector<1x4x256xf32>,
    return
  }
  func.func @transform_0(%arg0: i32) -> (i32, i32, i32) {
    %c0_i32 = arith.constant 0 : i32
    %c0_i32_0 = arith.constant 0 : i32
    %c0_i32_1 = arith.constant 0 : i32
    return %arg0, %c0_i32, %c0_i32_0 : i32, i32, i32
  }
  func.func @transform_1(%arg0: i32) -> (i32, i32) {
    %c0_i32 = arith.constant 0 : i32
    %c0_i32_0 = arith.constant 0 : i32
    %c0_i32_1 = arith.constant 0 : i32
    return %c0_i32, %c0_i32_0 : i32, i32
  }
  func.func @transform_2(%arg0: i32) -> (i32, i32) {
    %c0_i32 = arith.constant 0 : i32
    %c0_i32_0 = arith.constant 0 : i32
    %c0_i32_1 = arith.constant 0 : i32
    return %c0_i32, %c0_i32_0 : i32, i32
  }
  func.func @transform_3(%arg0: i32) -> (i32, i32) {
    %c0_i32 = arith.constant 0 : i32
    %c0_i32_0 = arith.constant 0 : i32
    %c0_i32_1 = arith.constant 0 : i32
    return %c0_i32, %c0_i32_0 : i32, i32
  }
  func.func @transform_4(%arg0: i32) -> (i32, i32) {
    %c0_i32 = arith.constant 0 : i32
    %c0_i32_0 = arith.constant 0 : i32
    %c0_i32_1 = arith.constant 0 : i32
    return %c0_i32, %c0_i32_0 : i32, i32
  }
  func.func @transform_5(%arg0: i32) -> (i32, i32) {
    %c0_i32 = arith.constant 0 : i32
    %c0_i32_0 = arith.constant 0 : i32
    %c0_i32_1 = arith.constant 0 : i32
    return %c0_i32, %c0_i32_0 : i32, i32
  }
  func.func @transform_6(%arg0: i32) -> (i32, i32) {
    %c0_i32 = arith.constant 0 : i32
    %c0_i32_0 = arith.constant 0 : i32
    %c0_i32_1 = arith.constant 0 : i32
    return %c0_i32, %c0_i32_0 : i32, i32
  }
  func.func @transform_7(%arg0: i32) -> (i32, i32) {
    %c0_i32 = arith.constant 0 : i32
    %c0_i32_0 = arith.constant 0 : i32
    %c0_i32_1 = arith.constant 0 : i32
    return %c0_i32, %c0_i32_0 : i32, i32
  }
  func.func @transform_8(%arg0: i32) -> (i32, i32) {
    %c0_i32 = arith.constant 0 : i32
    %c0_i32_0 = arith.constant 0 : i32
    %c0_i32_1 = arith.constant 0 : i32
    return %c0_i32, %c0_i32_0 : i32, i32
  }
  func.func @transform_9(%arg0: i32) -> (i32, i32) {
    %c0_i32 = arith.constant 0 : i32
    %c0_i32_0 = arith.constant 0 : i32
    %c0_i32_1 = arith.constant 0 : i32
    return %c0_i32, %c0_i32_0 : i32, i32
  }
  func.func @transform_10(%arg0: i32) -> (i32, i32, i32) {
    %c0_i32 = arith.constant 0 : i32
    %c0_i32_0 = arith.constant 0 : i32
    %c0_i32_1 = arith.constant 0 : i32
    return %arg0, %c0_i32, %c0_i32_0 : i32, i32, i32
  }
}

</mosaic_0001>

<bundles_post_ra>
// kernel: tpu_custom_call.1
= control target key start
LH: loop header
LB: loop body
LE: loop exit
PB: predicated region body
PF: predicated region fallthrough
CT: control target
= control target key end

     0   :  { %s2529_s0 = inlined_call_operand.vmem [shape: f32[2,4,256], index: 0, kind: input, shape index: {}]   ;;  %s2530_s1 = inlined_call_operand.vmem [shape: f32[24,4], index: 1, kind: input, shape index: {}]   ;;  %s2531_s2 = inlined_call_operand.vmem [shape: f32[24,1], index: 2, kind: input, shape index: {}]   ;;  %s2532_s3 = inlined_call_operand.vmem [shape: f32[24,1], index: 3, kind: input, shape index: {}]   ;;  %s2533_s4 = inlined_call_operand.vmem [shape: f32[24,9], index: 4, kind: input, shape index: {}]   ;;  %s2534_s5 = inlined_call_operand.vmem [shape: f32[24,1], index: 5, kind: input, shape index: {}]   ;;  %s2535_s6 = inlined_call_operand.vmem [shape: f32[24,1], index: 6, kind: input, shape index: {}]   ;;  %s2536_s7 = inlined_call_operand.vmem [shape: f32[4,24], index: 7, kind: input, shape index: {}]   ;;  %s2537_s8 = inlined_call_operand.vmem [shape: f32[4,1], index: 8, kind: input, shape index: {}]   ;;  %s2538_s9 = inlined_call_operand.vmem [shape: f32[4,1], index: 9, kind: input, shape index: {}]   ;;  %s2539_s10 = inlined_call_operand.hbm [shape: f32[2,4,256], index: 10, kind: output, shape index: {}]  }
   0x1   :  { %2540 = sst [smem:[#allocation6_spill]] %s2529_s0 }
   0x2   :  { %15 = vsyncpa [#allocation4], 0 }
   0x3   :  { %17 = vsyncpa [#allocation4 + $0x1], 0  ;;  %s1826_s13 = smov 0   ;;  %s1828_s14 = smov 0  }
   0x4   :  { %s1830_s15 = smov 0   ;;  %s1832_s16 = smov 0  }
   0x5 LB: > { %s1847_s17 = sadd.s32 4294967295, %s1753_s16   ;;  %s1587_s18 = sadd.s32 4294967294, %s1753_s16   ;;  %s1753_s16 = sphi %s1832_s16, %s2555_s16   ;;  %s1749_s15 = sphi %s1830_s15, %s2554_s15   ;;  %s1745_s14 = sphi %s1828_s14, %s2553_s14   ;;  %s1741_s13 = sphi %s1826_s13, %s2552_s13  }
   0x6   : > { %s1851_s19 = sadd.s32 1, %s1753_s16   ;;  %s245_s20 = sadd.s32 1, %s1749_s15 }
   0x7   : > { %s242_s21 = ssub.s32 %s1753_s16, %s1851_s19  ;;  %p255_p0 = scmp.ne.s32.totalorder %s1749_s15, %s1745_s14 }
   0x8   : > { %p243_p1 = scmp.eq.s32.totalorder %s242_s21, 0  ;;  %p256_p2 = scmp.eq.s32.totalorder %s1847_s17, 1 }
   0x9   : > { %p261_p3 = scmp.ne.s32.totalorder %s1745_s14, %s1741_s13  ;;  %p262_p4 = scmp.eq.s32.totalorder %s1587_s18, 1 }
   0xa   : > { %s1862_s22 = scalar_select %p243_p1, %s1749_s15, %s245_s20  }
   0xb   : > { %p1864_p5 = por %p256_p2, %p255_p0  ;;  %p1868_p6 = por %p262_p4, %p261_p3 }
   0xc   : > { %p1590_p7 = scmp.ge.s32.totalorder %s1753_s16, 1  ;;  %p315_p8 = scmp.lt.s32.totalorder %s1753_s16, 3 }
   0xe   : > { %p316_p9 = pnand %p1590_p7, %p315_p8 }
   0xf   : > { %p353_p10 = scmp.lt.s32.totalorder (!%p316_p9), %s1847_s17, 1  ;;  %s2543_s0 = sld [smem:[#allocation6_spill]] (!%p316_p9) }
  0x10   : > { %319 = sbr.rel (%p316_p9) target bundleno = 1030 (0x406), region = 60  ;;  %s1764_s12 = smov (!%p316_p9), 112  }
  0x11   : > { %s1765_s18 = smov (!%p316_p9), 96   ;;  %s1767_s20 = smov (!%p316_p9), 17  }
  0x12   : > { %s1768_s21 = smov (!%p316_p9), 15   ;;  %s350_s26 = sand.u32 (!%p316_p9), 1, %s1745_s14  }
  0x15   : > { %v361_v0 = vld [vmem:[%s2530_s1 + $0x10] sm:$0xff]  ;;  %v1755_v1 = vmov 2   ;;  %v1756_v2 = vmov 1   ;;  %v360_v3 = vld [vmem:[%s2530_s1 + $0x8] sm:$0xff]  ;;  %v1757_v4 = vmov 3   ;;  %v359_v5 = vld [vmem:[%s2530_s1] sm:$0xff]  ;;  %v382_v25 = vlaneseq }
  0x16   : > { %1657 = vset.pattern.permute.xlu1 %v1755_v1  ;;  %1656 = vset.pattern.permute.xlu0 %v1756_v2  ;;  %v1758_v6 = vmov 0   ;;  %v533_v7 = vld [vmem:[%s2531_s2 + $0x8] sm:$0xff]  ;;  %v1900_v9 = vld [vmem:[%s2533_s4 + $0x10] sm:$0xff]  ;;  %v1759_v11 = vmov 5   ;;  %v532_v14 = vld [vmem:[%s2531_s2] sm:$0xff]  ;;  %v1760_v16 = vmov 6  }
  0x17   : > { %451 = vperm.xlu1 %1657, %v361_v0   ;;  %415 = vperm.xlu0 %1656, %v361_v0   ;;  %v557_v8 = vld [vmem:[%s2532_s3 + $0x8] sm:$0xff]  ;;  %v534_v10 = vld [vmem:[%s2531_s2 + $0x10] sm:$0xff]  ;;  %v1923_v15 = vld [vmem:[%s2533_s4] sm:$0xff]  ;;  %v1761_v18 = vmov 0.0   ;;  %vm589_vm0 = vcmask 195584   ;;  %v1762_v19 = vmov 8  }
  0x18   : > { %v558_v12 = vld [vmem:[%s2532_s3 + $0x10] sm:$0xff]  ;;  %v1914_v13 = vld [vmem:[%s2533_s4 + $0x8] sm:$0xff]  ;;  %v556_v17 = vld [vmem:[%s2532_s3] sm:$0xff]  ;;  %588 = vst [vmem:[#allocation2 + $0x40] sm:$0xff] %v1761_v18  ;;  %1481 = vmatprep.mubr.f32.mxu0 %v1761_v18  ;;  %v1763_v20 = vmov 4   ;;  %s354_s27 = scalar_select %p353_p10, %s1847_s17, 1 }
  0x19   : > { %592 = vst.msk [vmem:[#allocation2 + $0x58] sm:$0xff] %vm589_vm0, %v1761_v18  ;;  %590 = vst.msk [vmem:[#allocation2 + $0x18] sm:$0xff] %vm589_vm0, %v1761_v18  ;;  %v383_v28 = vshrl.u32 %v382_v25, 7  ;;  %vm699_vm1 = vcmask 916480   ;;  %vm778_vm2 = vcmask 785408   ;;  %vm999_vm3 = vcmask 138240  }
  0x1a   : > { %591 = vst.msk [vmem:[#allocation2 + $0x38] sm:$0xff] %vm589_vm0, %v1761_v18  ;;  %s1600_s28 = sshll.u32 %s354_s27, 3  ;;  %vm1253_vm6 = vcmask 121856   ;;  %vm1401_vm9 = vcmask 130048   ;;  %s1601_s27 = sshll.u32 %s1847_s17, 7 }
  0x1b   : > { %1658 = vset.pattern.permute.xlu1 %v1757_v4  ;;  %411 = vperm.xlu0 %1656, %v360_v3   ;;  %s1961_s11 = scalar_lea.vmem %s2543_s0, %s1600_s28  ;;  %v420_v29 = vsub.s32 1, %v383_v28  ;;  %v424_v30 = vsub.s32 5, %v383_v28  ;;  %v384_v31 = vsub.s32 0, %v383_v28  ;;  %v388_v32 = vsub.s32 4, %v383_v28 }
  0x1c   : > { %487 = vperm.xlu1 %1658, %v361_v0   ;;  %v456_v35 = vsub.s32 2, %v383_v28  ;;  %v460_v36 = vsub.s32 6, %v383_v28  ;;  %v358_v37 = vld [vmem:[%s1961_s11] sm:$0xff]  ;;  %v492_v38 = vsub.s32 3, %v383_v28  ;;  %v496_v39 = vsub.s32 7, %v383_v28 }
  0x1d   : > { %v421_v40 = vrot.slane %v358_v37, %v420_v29  ;;  %v425_v41 = vrot.slane %v358_v37, %v424_v30  ;;  %v385_v42 = vrot.slane %v358_v37, %v384_v31  ;;  %v389_v43 = vrot.slane %v358_v37, %v388_v32 }
  0x1e   : > { %v457_v46 = vrot.slane %v358_v37, %v456_v35  ;;  %v461_v47 = vrot.slane %v358_v37, %v460_v36  ;;  %v493_v48 = vrot.slane %v358_v37, %v492_v38  ;;  %v497_v49 = vrot.slane %v358_v37, %v496_v39 }
  0x1f   : > { %1663 = vset.pattern.permute.xlu0 %v1755_v1  ;;  %v431_v50 = vrot.slane %v421_v40, %v420_v29  ;;  %v435_v51 = vrot.slane %v425_v41, %v420_v29  ;;  %v395_v52 = vrot.slane %v385_v42, %v384_v31  ;;  %v399_v53 = vrot.slane %v389_v43, %v384_v31 }
  0x20   : > { %1659 = vset.pattern.permute.xlu1 %v1758_v6  ;;  %443 = vperm.xlu0 %1663, %v359_v5   ;;  %v467_v55 = vrot.slane %v457_v46, %v456_v35  ;;  %v471_v56 = vrot.slane %v461_v47, %v456_v35  ;;  %v503_v57 = vrot.slane %v493_v48, %v492_v38 }
  0x21   : > { %373 = vperm.xlu1 %1659, %v360_v3   ;;  %v507_v58 = vrot.slane %v497_v49, %v492_v38 }
  0x24   : > { %1664 = vset.pattern.permute.xlu0 %v1758_v6 }
  0x25   : > { %1660 = vset.pattern.permute.xlu1 %v1755_v1  ;;  %378 = vperm.xlu0 %1664, %v361_v0  }
  0x26   : > { %447 = vperm.xlu1 %1660, %v360_v3  }
  0x29   : > { %542 = vperm.xlu0 %1664, %v533_v7  }
  0x2a   : > { %1661 = vset.pattern.permute.xlu1 %v1758_v6 }
  0x2b   : > { %368 = vperm.xlu1 %1661, %v359_v5  }
  0x2d   : > { %566 = vperm.xlu0 %1664, %v557_v8  }
  0x2f   : > { %1662 = vset.pattern.permute.xlu1 %v1756_v2 }
  0x30   : > { %407 = vperm.xlu1 %1662, %v359_v5  }
  0x31   : > { %1667 = vset.pattern.permute.xlu0 %v1757_v4 }
  0x32   : > { %483 = vperm.xlu0 %1667, %v360_v3  }
  0x34   : > { %1665 = vset.pattern.permute.xlu1 %v1757_v4 }
  0x35   : > { %479 = vperm.xlu1 %1665, %v359_v5  }
  0x36   : > { %833 = vperm.xlu0 %1667, %v1900_v9  }
  0x39   : > { %1666 = vset.pattern.permute.xlu1 %v1758_v6 }
  0x3a   : > { %1670 = vset.pattern.permute.xlu0 %v1759_v11  ;;  %547 = vperm.xlu1 %1666, %v534_v10  }
  0x3b   : > { %1087 = vperm.xlu0 %1670, %v1900_v9  }
  0x3e   : > { %571 = vperm.xlu1 %1666, %v558_v12  }
  0x3f   : > { %1083 = vperm.xlu0 %1670, %v1914_v13  }
  0x42   : > { %537 = vperm.xlu1 %1666, %v532_v14  }
  0x43   : > { %1674 = vset.pattern.permute.xlu0 %v1760_v16 }
  0x44   : > { %897 = vperm.xlu0 %1674, %v1923_v15  }
  0x46   : > { %561 = vperm.xlu1 %1666, %v556_v17  }
  0x48   : > { %1677 = vset.pattern.permute.xlu0 %v1762_v19 }
  0x49   : > { %1151 = vperm.xlu0 %1677, %v1923_v15  }
  0x4a   : > { %1668 = vset.pattern.permute.xlu1 %v1757_v4 }
  0x4b   : > { %829 = vperm.xlu1 %1668, %v1914_v13  }
  0x4d   : > { %1679 = vset.pattern.permute.xlu0 %v1755_v1 }
  0x4e   : > { %1066 = vperm.xlu0 %1679, %v1900_v9  }
  0x4f   : > { %1669 = vset.pattern.permute.xlu1 %v1760_v16 }
  0x50   : > { %905 = vperm.xlu1 %1669, %v1900_v9  }
  0x52   : > { %1682 = vset.pattern.permute.xlu0 %v1763_v20 }
  0x54   : > { %1671 = vset.pattern.permute.xlu1 %v1757_v4 }
  0x55   : > { %825 = vperm.xlu1 %1671, %v1923_v15  }
  0x59   : > { %1672 = vset.pattern.permute.xlu1 %v1760_v16 }
  0x5a   : > { %901 = vperm.xlu1 %1672, %v1914_v13  }
  0x5e   : > { %1673 = vset.pattern.permute.xlu1 %v1762_v19 }
  0x5f   : > { %1159 = vperm.xlu1 %1673, %v1900_v9  }
  0x63   : > { %1675 = vset.pattern.permute.xlu1 %v1759_v11 }
  0x64   : > { %1079 = vperm.xlu1 %1675, %v1923_v15  }
  0x68   : > { %1676 = vset.pattern.permute.xlu1 %v1762_v19 }
  0x69   : > { %1155 = vperm.xlu1 %1676, %v1914_v13  }
  0x6d   : > { %1678 = vset.pattern.permute.xlu1 %v1758_v6 }
  0x6e   : > { %812 = vperm.xlu1 %1678, %v1900_v9  }
  0x72   : > { %808 = vperm.xlu1 %1678, %v1914_v13  }
  0x76   : > { %804 = vperm.xlu1 %1678, %v1923_v15  }
  0x7a   : > { %1680 = vset.pattern.permute.xlu1 %v1755_v1 }
  0x7b   : > { %1062 = vperm.xlu1 %1680, %v1914_v13  }
  0x7f   : > { %1058 = vperm.xlu1 %1680, %v1923_v15  }
  0x83   : > { %1681 = vset.pattern.permute.xlu1 %v1763_v20 }
  0x92   : > { %v1951_v21 = vpop.permute.xlu1 %451  ;;  %v416_v22 = vpop.permute.xlu0 %415 }
  0x93   : > { %v440_v0 = vmul.f32 %v431_v50, %v416_v22  ;;  %v441_v1 = vmul.f32 %v435_v51, %v416_v22 }
  0x96   : > { %v412_v23 = vpop.permute.xlu0 %411 }
  0x97   : > { %v488_v24 = vpop.permute.xlu1 %487  ;;  %v438_v60 = vmul.f32 %v431_v50, %v412_v23  ;;  %v439_v61 = vmul.f32 %v435_v51, %v412_v23  ;;  %v476_v23 = vmul.f32 %v467_v55, %v1951_v21 }
  0x98   : > { %v512_v12 = vmul.f32 %v503_v57, %v488_v24  ;;  %v513_v14 = vmul.f32 %v507_v58, %v488_v24 }
  0x9b   : > { %v1955_v26 = vpop.permute.xlu0 %443 }
  0x9c   : > { %v374_v27 = vpop.permute.xlu1 %373  ;;  %v472_v37 = vmul.f32 %v467_v55, %v1955_v26  ;;  %v473_v38 = vmul.f32 %v471_v56, %v1955_v26 }
  0x9d   : > { %v402_v62 = vmul.f32 %v395_v52, %v374_v27  ;;  %v403_v63 = vmul.f32 %v399_v53, %v374_v27  ;;  %v477_v27 = vmul.f32 %v471_v56, %v1951_v21 }
  0x9f   : > { %v516_v16 = vadd.f32 %v438_v60, %v402_v62  ;;  %v517_v17 = vadd.f32 %v439_v61, %v403_v63  ;;  %v525_v35 = vadd.f32 %v513_v14, %v477_v27  ;;  %v1988_v14 = vld [vmem:[#allocation2 + $0x58] sm:$0xff] }
  0xa0   : > { %v379_v33 = vpop.permute.xlu0 %378  ;;  %v1995_v27 = vld [vmem:[#allocation2 + $0x38] sm:$0xff] }
  0xa1   : > { %v448_v34 = vpop.permute.xlu1 %447  ;;  %v404_v3 = vmul.f32 %v395_v52, %v379_v33  ;;  %v405_v4 = vmul.f32 %v399_v53, %v379_v33 }
  0xa2   : > { %v474_v7 = vmul.f32 %v467_v55, %v448_v34  ;;  %v475_v8 = vmul.f32 %v471_v56, %v448_v34  ;;  %v524_v34 = vadd.f32 %v512_v12, %v476_v23 }
  0xa3   : > { %v518_v29 = vadd.f32 %v440_v0, %v404_v3  ;;  %v519_v22 = vadd.f32 %v441_v1, %v405_v4 }
  0xa4   : > { %v543_v44 = vpop.permute.xlu0 %542 }
  0xa5   : > { %v530_v39 = vadd.f32 %v524_v34, %v518_v29  ;;  %v531_v40 = vadd.f32 %v525_v35, %v519_v22  ;;  %v1998_v29 = vld [vmem:[#allocation2 + $0x18] sm:$0xff] }
  0xa6   : > { %v1964_v45 = vpop.permute.xlu1 %368 }
  0xa7   : > { %v400_v62 = vmul.f32 %v395_v52, %v1964_v45  ;;  %v401_v55 = vmul.f32 %v399_v53, %v1964_v45 }
  0xa8   : > { %v567_v54 = vpop.permute.xlu0 %566 }
  0xab   : > { %v408_v59 = vpop.permute.xlu1 %407 }
  0xac   : > { %v436_v47 = vmul.f32 %v431_v50, %v408_v59  ;;  %v437_v48 = vmul.f32 %v435_v51, %v408_v59 }
  0xad   : > { %v484_v5 = vpop.permute.xlu0 %483 }
  0xae   : > { %v510_v10 = vmul.f32 %v503_v57, %v484_v5  ;;  %v511_v11 = vmul.f32 %v507_v58, %v484_v5 }
  0xb0   : > { %v522_v18 = vadd.f32 %v510_v10, %v474_v7  ;;  %v523_v19 = vadd.f32 %v511_v11, %v475_v8  ;;  %v480_v28 = vpop.permute.xlu1 %479 }
  0xb1   : > { %v1968_v30 = vpop.permute.xlu0 %833  ;;  %v508_v43 = vmul.f32 %v503_v57, %v480_v28  ;;  %v509_v46 = vmul.f32 %v507_v58, %v480_v28  ;;  %v515_v57 = vadd.f32 %v437_v48, %v401_v55 }
  0xb2   : > { %v528_v31 = vadd.f32 %v522_v18, %v516_v16  ;;  %v529_v32 = vadd.f32 %v523_v19, %v517_v17  ;;  %v842_v33 = vmul.f32 0.0, %v1968_v30 }
  0xb3   : > { %v520_v56 = vadd.f32 %v508_v43, %v472_v37  ;;  %v521_v63 = vadd.f32 %v509_v46, %v473_v38 }
  0xb4   : > { %v552_v24 = vmul.f32 %v543_v44, %v528_v31  ;;  %v553_v36 = vmul.f32 %v543_v44, %v529_v32  ;;  %866 = vrot.lane.b32.xlu0 %v842_v33, %s1764_s12 }
  0xb5   : > { %v548_v21 = vpop.permute.xlu1 %547  ;;  %v527_v3 = vadd.f32 %v521_v63, %v515_v57 }
  0xb6   : > { %v576_v41 = vadd.f32 %v567_v54, %v552_v24  ;;  %v577_v42 = vadd.f32 %v567_v54, %v553_v36  ;;  %v554_v44 = vmul.f32 %v548_v21, %v530_v39  ;;  %v555_v61 = vmul.f32 %v548_v21, %v531_v40  ;;  %v1088_v12 = vpop.permute.xlu0 %1087 }
  0xb7   : > { %v514_v54 = vadd.f32 %v436_v47, %v400_v62  ;;  %v1098_v16 = vmul.f32 %v1088_v12, %v1988_v14 }
  0xb8   : > { %v1974_v49 = vmax.f32 %v576_v41, 0.0  ;;  %v1976_v60 = vmax.f32 %v577_v42, 0.0 }
  0xb9   : > { %v572_v26 = vpop.permute.xlu1 %571  ;;  %v526_v59 = vadd.f32 %v520_v56, %v514_v54 }
  0xba   : > { %v578_v0 = vadd.f32 %v572_v26, %v554_v44  ;;  %v579_v1 = vadd.f32 %v572_v26, %v555_v61  ;;  %v1084_v23 = vpop.permute.xlu0 %1083 }
  0xbb   : > { %v1095_v31 = vmul.f32 %v1084_v23, %v1995_v27  ;;  %v1093_v44 = vmul.f32 %v1084_v23, %v1974_v49  ;;  %v1094_v55 = vmul.f32 %v1084_v23, %v1976_v60 }
  0xbc   : > { %v1980_v58 = vmax.f32 %v578_v0, 0.0  ;;  %v1982_v50 = vmax.f32 %v579_v1, 0.0 }
  0xbd   : > { %v538_v51 = vpop.permute.xlu1 %537 }
  0xbe   : > { %v550_v4 = vmul.f32 %v538_v51, %v526_v59  ;;  %v551_v5 = vmul.f32 %v538_v51, %v527_v3  ;;  %v843_v36 = vmul.f32 %v1968_v30, %v1980_v58  ;;  %v844_v39 = vmul.f32 %v1968_v30, %v1982_v50 }
  0xbf   : > { %v898_v32 = vpop.permute.xlu0 %897  ;;  %v1097_v42 = vmul.f32 %v1088_v12, %v1982_v50  ;;  %v1096_v30 = vmul.f32 %v1088_v12, %v1980_v58 }
  0xc0   : > { %v910_v34 = vmul.f32 %v898_v32, %v1998_v29 }
  0xc1   : > { %v562_v7 = vpop.permute.xlu1 %561 }
  0xc2   : > { %v574_v52 = vadd.f32 %v562_v7, %v550_v4  ;;  %v575_v8 = vadd.f32 %v562_v7, %v551_v5 }
  0xc4   : > { %v1984_v45 = vmax.f32 %v574_v52, 0.0  ;;  %v1986_v53 = vmax.f32 %v575_v8, 0.0  ;;  %v1152_v59 = vpop.permute.xlu0 %1151  ;;  %v1766_v52 = vmov 7  }
  0xc5   : > { %v1164_v7 = vmul.f32 %v1152_v59, %v1998_v29 }
  0xc6   : > { %v830_v10 = vpop.permute.xlu1 %829  ;;  %v908_v26 = vmul.f32 %v898_v32, %v1984_v45  ;;  %v909_v1 = vmul.f32 %v898_v32, %v1986_v53  ;;  %v1163_v4 = vmul.f32 %v1152_v59, %v1986_v53  ;;  %v1162_v5 = vmul.f32 %v1152_v59, %v1984_v45 }
  0xc7   : > { %v839_v11 = vmul.f32 0.0, %v830_v10  ;;  %v840_v21 = vmul.f32 %v830_v10, %v1974_v49  ;;  %v841_v41 = vmul.f32 %v830_v10, %v1976_v60 }
  0xc9   : > { %860 = vrot.lane.b32.xlu0 %v839_v11, %s1764_s12  ;;  %v2084_v11 = vpop.permute.xlu0 %1066 }
  0xcb   : > { %v906_v17 = vpop.permute.xlu1 %905 }
  0xcc   : > { %v916_v18 = vmul.f32 %v906_v17, %v1988_v14  ;;  %v914_v40 = vmul.f32 %v906_v17, %v1980_v58  ;;  %v915_v43 = vmul.f32 %v906_v17, %v1982_v50 }
  0xcd   : > { %1124 = vrot.lane.b32.xlu0 %v1098_v16, %s1764_s12 }
  0xce   : > { %942 = vrot.lane.b32.xlu1 %v916_v18, %s1765_s18 }
  0xd0   : > { %v826_v19 = vpop.permute.xlu1 %825 }
  0xd1   : > { %v836_v28 = vmul.f32 0.0, %v826_v19  ;;  %v838_v46 = vmul.f32 %v826_v19, %v1986_v53  ;;  %v837_v48 = vmul.f32 %v826_v19, %v1984_v45 }
  0xd3   : > { %854 = vrot.lane.b32.xlu1 %v836_v28, %s1764_s12 }
  0xd5   : > { %v902_v22 = vpop.permute.xlu1 %901 }
  0xd6   : > { %v913_v33 = vmul.f32 %v902_v22, %v1995_v27  ;;  %v912_v47 = vmul.f32 %v902_v22, %v1976_v60  ;;  %v911_v61 = vmul.f32 %v902_v22, %v1974_v49 }
  0xd7   : > { %1118 = vrot.lane.b32.xlu1 %v1095_v31, %s1764_s12 }
  0xd8   : > { %936 = vrot.lane.b32.xlu0 %v913_v33, %s1765_s18 }
  0xda   : > { %v1160_v35 = vpop.permute.xlu1 %1159 }
  0xdb   : > { %930 = vrot.lane.b32.xlu1 %v910_v34, %s1765_s18  ;;  %v1170_v24 = vmul.f32 %v1160_v35, %v1988_v14  ;;  %v1169_v62 = vmul.f32 %v1160_v35, %v1982_v50  ;;  %v1168_v56 = vmul.f32 %v1160_v35, %v1980_v58 }
  0xdd   : > { %1196 = vrot.lane.b32.xlu0 %v1170_v24, %s1765_s18 }
  0xdf   : > { %v1080_v37 = vpop.permute.xlu1 %1079  ;;  %868 = vrot.lane.b32.xlu1 %v843_v36, %s1764_s12 }
  0xe0   : > { %v1092_v38 = vmul.f32 %v1080_v37, %v1998_v29  ;;  %v1091_v63 = vmul.f32 %v1080_v37, %v1986_v53  ;;  %v1090_v51 = vmul.f32 %v1080_v37, %v1984_v45 }
  0xe2   : > { %1112 = vrot.lane.b32.xlu0 %v1092_v38, %s1764_s12 }
  0xe3   : > { %862 = vrot.lane.b32.xlu1 %v840_v21, %s1764_s12 }
  0xe4   : > { %v1156_v0 = vpop.permute.xlu1 %1155 }
  0xe5   : > { %v1165_v54 = vmul.f32 %v1156_v0, %v1974_v49  ;;  %v1167_v57 = vmul.f32 %v1156_v0, %v1995_v27  ;;  %v1166_v3 = vmul.f32 %v1156_v0, %v1976_v60 }
  0xe6   : > { %870 = vrot.lane.b32.xlu0 %v844_v39, %s1764_s12 }
  0xe7   : > { %938 = vrot.lane.b32.xlu1 %v914_v40, %s1765_s18 }
  0xe9   : > { %v2072_v8 = vpop.permute.xlu1 %812 }
  0xea   : > { %864 = vrot.lane.b32.xlu0 %v841_v41, %s1764_s12  ;;  %v1077_v41 = vmul.f32 %v2084_v11, %v1982_v50 }
  0xeb   : > { %1122 = vrot.lane.b32.xlu1 %v1097_v42, %s1764_s12 }
  0xee   : > { %940 = vrot.lane.b32.xlu0 %v915_v43, %s1765_s18 }
  0xef   : > { %858 = vrot.lane.b32.xlu1 %v838_v46, %s1764_s12 }
  0xf2   : > { %1120 = vrot.lane.b32.xlu0 %v1096_v30, %s1764_s12 }
  0xf3   : > { %934 = vrot.lane.b32.xlu1 %v912_v47, %s1765_s18 }
  0xf6   : > { %856 = vrot.lane.b32.xlu0 %v837_v48, %s1764_s12 }
  0xf7   : > { %1114 = vrot.lane.b32.xlu1 %v1093_v44, %s1764_s12 }
  0xfa   : > { %932 = vrot.lane.b32.xlu0 %v911_v61, %s1765_s18 }
  0xfb   : > { %1194 = vrot.lane.b32.xlu1 %v1169_v62, %s1765_s18 }
  0xfe   : > { %1116 = vrot.lane.b32.xlu0 %v1094_v55, %s1764_s12 }
  0xff   : > { %926 = vrot.lane.b32.xlu1 %v908_v26, %s1765_s18 }
 0x102   : > { %1192 = vrot.lane.b32.xlu0 %v1168_v56, %s1765_s18 }
 0x103   : > { %1110 = vrot.lane.b32.xlu1 %v1091_v63, %s1764_s12 }
 0x106   : > { %928 = vrot.lane.b32.xlu0 %v909_v1, %s1765_s18 }
 0x107   : > { %1186 = vrot.lane.b32.xlu1 %v1165_v54, %s1765_s18 }
 0x10a   : > { %1108 = vrot.lane.b32.xlu0 %v1090_v51, %s1764_s12 }
 0x10b   : > { %1190 = vrot.lane.b32.xlu1 %v1167_v57, %s1765_s18 }
 0x10e   : > { %1188 = vrot.lane.b32.xlu0 %v1166_v3, %s1765_s18 }
 0x10f   : > { %1182 = vrot.lane.b32.xlu1 %v1163_v4, %s1765_s18 }
 0x112   : > { %1180 = vrot.lane.b32.xlu0 %v1162_v5, %s1765_s18 }
 0x113   : > { %672 = vperm.xlu1 %1681, %v1900_v9  }
 0x116   : > { %1184 = vrot.lane.b32.xlu0 %v1164_v7, %s1765_s18 }
 0x117   : > { %1683 = vset.pattern.permute.xlu1 %v1766_v52 }
 0x118   : > { %739 = vperm.xlu1 %1683, %v1900_v9  }
 0x11a   : > { %668 = vperm.xlu0 %1682, %v1914_v13  }
 0x11c   : > { %1684 = vset.pattern.permute.xlu1 %v1763_v20  ;;  %v2078_v20 = vpop.permute.xlu1 %808 }
 0x11d   : > { %664 = vperm.xlu1 %1684, %v1923_v15   ;;  %v820_v51 = vmul.f32 %v2078_v20, %v1976_v60 }
 0x11e   : > { %1685 = vset.pattern.permute.xlu0 %v1766_v52 }
 0x11f   : > { %735 = vperm.xlu0 %1685, %v1914_v13  }
 0x120   : > { %v2082_v10 = vpop.permute.xlu1 %804 }
 0x121   : > { %1686 = vset.pattern.permute.xlu1 %v1766_v52  ;;  %v817_v52 = vmul.f32 %v2082_v10, %v1986_v53 }
 0x122   : > { %731 = vperm.xlu1 %1686, %v1923_v15  }
 0x123   : > { %1688 = vset.pattern.permute.xlu0 %v1756_v2 }
 0x124   : > { %646 = vperm.xlu0 %1688, %v1914_v13   ;;  %v2086_v12 = vpop.permute.xlu1 %1062 }
 0x126   : > { %1687 = vset.pattern.permute.xlu1 %v1756_v2  ;;  %v2088_v16 = vpop.permute.xlu0 %866 }
 0x127   : > { %651 = vperm.xlu1 %1687, %v1900_v9  }
 0x128   : > { %1690 = vset.pattern.permute.xlu0 %v1758_v6  ;;  %v2090_v13 = vpop.permute.xlu1 %1058 }
 0x12b   : > { %641 = vperm.xlu1 %1687, %v1923_v15  }
 0x12f   : > { %1689 = vset.pattern.permute.xlu1 %v1758_v6 }
 0x13b   : > { %v2092_v2 = vpop.permute.xlu0 %860 }
 0x13f   : > { %v1125_v17 = vpop.permute.xlu0 %1124 }
 0x140   : > { %v943_v9 = vpop.permute.xlu1 %942 }
 0x145   : > { %v2094_v18 = vpop.permute.xlu1 %854 }
 0x149   : > { %v2096_v19 = vpop.permute.xlu1 %1118 }
 0x14a   : > { %v937_v15 = vpop.permute.xlu0 %936 }
 0x14d   : > { %v931_v6 = vpop.permute.xlu1 %930 }
 0x14f   : > { %v1197_v28 = vpop.permute.xlu0 %1196 }
 0x151   : > { %v2098_v23 = vpop.permute.xlu1 %868 }
 0x154   : > { %v2100_v22 = vpop.permute.xlu0 %1112 }
 0x155   : > { %v2102_v31 = vpop.permute.xlu1 %862 }
 0x158   : > { %v871_v32 = vpop.permute.xlu0 %870 }
 0x159   : > { %v2104_v33 = vpop.permute.xlu1 %938 }
 0x15c   : > { %v2106_v34 = vpop.permute.xlu0 %864 }
 0x15d   : > { %v2108_v35 = vpop.permute.xlu1 %1122  ;;  %v892_v5 = vadd.f32 %v2106_v34, %v820_v51  ;;  %v1069_v51 = vmul.f32 0.0, %v2090_v13 }
 0x15e   : > { %v1131_v40 = vsel %vm699_vm1, %v2108_v35, %v1125_v17 }
 0x15f   : > { %v1149_v43 = vadd.f32 %v1131_v40, %v1077_v41  ;;  %v823_v41 = vmul.f32 %v2072_v8, %v1982_v50 }
 0x160   : > { %v941_v24 = vpop.permute.xlu0 %940 }
 0x161   : > { %v2110_v36 = vpop.permute.xlu1 %858 }
 0x162   : > { %v889_v40 = vadd.f32 %v2110_v36, %v817_v52  ;;  %v822_v52 = vmul.f32 %v2072_v8, %v1980_v58 }
 0x164   : > { %v2112_v37 = vpop.permute.xlu0 %1120 }
 0x165   : > { %v2114_v38 = vpop.permute.xlu1 %934 }
 0x166   : > { %v947_v4 = vsel %vm778_vm2, %v2114_v38, %v937_v15 }
 0x167   : > { %v964_v17 = vadd.f32 %v947_v4, %v892_v5  ;;  %v1075_v5 = vmul.f32 0.0, %v2084_v11 }
 0x168   : > { %v2116_v21 = vpop.permute.xlu0 %856 }
 0x169   : > { %v2118_v39 = vpop.permute.xlu1 %1114 }
 0x16c   : > { %v2124_v42 = vpop.permute.xlu0 %932 }
 0x16d   : > { %v2126_v46 = vpop.permute.xlu1 %1194 }
 0x16e   : > { %v1203_v30 = vsel %vm778_vm2, %v2126_v46, %v1197_v28 }
 0x16f   : > { %v2130_v47 = vadd.f32 %v1203_v30, %v1149_v43  ;;  %v949_v30 = vsel %vm778_vm2, %v941_v24, %v943_v9 }
 0x170   : > { %v2132_v48 = vpop.permute.xlu0 %1116 }
 0x171   : > { %v2134_v44 = vpop.permute.xlu1 %926 }
 0x174   : > { %v1193_v61 = vpop.permute.xlu0 %1192 }
 0x175   : > { %v2136_v62 = vpop.permute.xlu1 %1110 }
 0x178   : > { %v2138_v55 = vpop.permute.xlu0 %928 }
 0x179   : > { %v2140_v26 = vpop.permute.xlu1 %1186  ;;  %v945_v28 = vsel %vm778_vm2, %v2138_v55, %v931_v6 }
 0x17c   : > { %v2142_v56 = vpop.permute.xlu0 %1108 }
 0x17d   : > { %v2144_v63 = vpop.permute.xlu1 %1190  ;;  %v1141_v6 = vadd.f32 %v2142_v56, %v1069_v51  ;;  %v876_v51 = vsel %vm699_vm1, %v2088_v16, %v2098_v23  ;;  %v1202_v16 = vsel %vm778_vm2, %v1193_v61, %v2126_v46  ;;  %v815_v46 = vmul.f32 0.0, %v2082_v10 }
 0x180   : > { %v2146_v0 = vpop.permute.xlu0 %1188 }
 0x181   : > { %v2148_v1 = vpop.permute.xlu1 %1182 }
 0x184   : > { %v2150_v54 = vpop.permute.xlu0 %1180 }
 0x185   : > { %v1213_v9 = vadd.f32 %v2150_v54, %v1141_v6  ;;  %v821_v6 = vmul.f32 0.0, %v2072_v8  ;;  %v875_v8 = vsel %vm699_vm1, %v2102_v31, %v2106_v34 }
 0x188   : > { %v2159_v7 = vpop.permute.xlu0 %1184 }
 0x18e   : > { %v673_v57 = vpop.permute.xlu1 %672 }
 0x18f   : > { %v679_v59 = vmul.f32 %v673_v57, %v1980_v58  ;;  %v680_v3 = vmul.f32 %v673_v57, %v1982_v50  ;;  %v961_v57 = vadd.f32 %v945_v28, %v889_v40  ;;  %v1147_v28 = vadd.f32 %v2112_v37, %v1075_v5 }
 0x191   : > { %695 = vrot.lane.b32.xlu1 %v679_v59, %s1764_s12  ;;  %697 = vrot.lane.b32.xlu0 %v680_v3, %s1764_s12  ;;  %v895_v59 = vadd.f32 %v871_v32, %v823_v41  ;;  %v877_v3 = vsel %vm699_vm1, %v2098_v23, %v871_v32  ;;  %v874_v32 = vsel %vm699_vm1, %v2092_v2, %v2102_v31  ;;  %v1072_v41 = vmul.f32 0.0, %v2086_v12 }
 0x192   : > { %v894_v40 = vadd.f32 %v877_v3, %v822_v52  ;;  %v1130_v2 = vsel %vm699_vm1, %v2112_v37, %v2108_v35  ;;  %v893_v52 = vadd.f32 %v876_v51, %v821_v6  ;;  %v872_v37 = vsel %vm699_vm1, %v2094_v18, %v2116_v21 }
 0x193   : > { %v967_v4 = vadd.f32 %v949_v30, %v895_v59  ;;  %v887_v34 = vadd.f32 %v872_v37, %v815_v46  ;;  %v1073_v18 = vmul.f32 %v2086_v12, %v1974_v49 }
 0x194   : > { %v965_v35 = vadd.f32 %v2104_v33, %v893_v52  ;;  %v1340_v52 = vld [vmem:[%s2535_s6 + $0x10] sm:$0xff] }
 0x195   : > { %991 = vrot.lane.b32.xlu0 %v964_v17, %s1767_s20  ;;  %v2169_v15 = vpop.permute.xlu0 %668  ;;  %v948_v17 = vsel %vm778_vm2, %v2104_v33, %v941_v24  ;;  %v1144_v24 = vadd.f32 %v2118_v39, %v1072_v41 }
 0x196   : > { %v677_v43 = vmul.f32 %v2169_v15, %v1974_v49  ;;  %v966_v30 = vadd.f32 %v948_v17, %v894_v40  ;;  %v959_v17 = vadd.f32 %v2134_v44, %v887_v34  ;;  %v1127_v40 = vsel %vm699_vm1, %v2136_v62, %v2100_v22 }
 0x197   : > { %v1216_v3 = vadd.f32 %v2140_v26, %v1144_v24 }
 0x198   : > { %691 = vrot.lane.b32.xlu1 %v677_v43, %s1764_s12  ;;  %v1219_v43 = vadd.f32 %v1193_v61, %v1147_v28  ;;  %v946_v61 = vsel %vm778_vm2, %v2124_v42, %v2114_v38  ;;  %v1200_v38 = vsel %vm778_vm2, %v2140_v26, %v2146_v0  ;;  %v944_v26 = vsel %vm778_vm2, %v2134_v44, %v2138_v55 }
 0x199   : > { %985 = vrot.lane.b32.xlu0 %v961_v57, %s1767_s20  ;;  %v818_v57 = vmul.f32 0.0, %v2078_v20  ;;  %v1201_v55 = vsel %vm778_vm2, %v2146_v0, %v2144_v63  ;;  %v678_v63 = vmul.f32 %v2169_v15, %v1976_v60 }
 0x19a   : > { %v736_v15 = vpop.permute.xlu0 %735 }
 0x19b   : > { %v890_v59 = vadd.f32 %v874_v32, %v818_v57  ;;  %v1071_v32 = vmul.f32 %v2090_v13, %v1986_v53  ;;  %v1198_v57 = vsel %vm778_vm2, %v2150_v54, %v2148_v1  ;;  %v745_v51 = vmul.f32 %v736_v15, %v1974_v49 }
 0x19c   : > { %997 = vrot.lane.b32.xlu1 %v967_v4, %s1767_s20  ;;  %v1076_v4 = vmul.f32 %v2084_v11, %v1980_v58  ;;  %v819_v11 = vmul.f32 %v2078_v20, %v1974_v49  ;;  %v1128_v20 = vsel %vm699_vm1, %v2118_v39, %v2132_v48  ;;  %v816_v39 = vmul.f32 %v2082_v10, %v1984_v45 }
 0x19d   : > { %1235 = vrot.lane.b32.xlu0 %v1213_v9, %s1768_s21  ;;  %v962_v5 = vadd.f32 %v2124_v42, %v890_v59  ;;  %v873_v42 = vsel %vm699_vm1, %v2116_v21, %v2110_v36  ;;  %v1145_v28 = vadd.f32 %v1128_v20, %v1073_v18  ;;  %v1199_v36 = vsel %vm778_vm2, %v2148_v1, %v2159_v7 }
 0x19e   : > { %v1148_v23 = vadd.f32 %v1130_v2, %v1076_v4  ;;  %v891_v31 = vadd.f32 %v875_v8, %v819_v11  ;;  %v1129_v10 = vsel %vm699_vm1, %v2132_v48, %v2096_v19  ;;  %v1143_v22 = vadd.f32 %v1127_v40, %v1071_v32  ;;  %v1339_v8 = vld [vmem:[%s2535_s6 + $0x8] sm:$0xff] }
 0x19f   : > { %v1217_v41 = vadd.f32 %v1200_v38, %v1145_v28  ;;  %v1074_v21 = vmul.f32 %v2086_v12, %v1976_v60  ;;  %v1070_v19 = vmul.f32 %v2090_v13, %v1984_v45  ;;  %v740_v12 = vpop.permute.xlu1 %739  ;;  %v747_v59 = vmul.f32 %v736_v15, %v1995_v27  ;;  %v1313_v27 = vld [vmem:[%s2534_s5 + $0x10] sm:$0xff] }
 0x1a0   : > { %1247 = vrot.lane.b32.xlu1 %v1219_v43, %s1768_s21  ;;  %v1220_v9 = vadd.f32 %v1202_v16, %v1148_v23  ;;  %v963_v33 = vadd.f32 %v946_v61, %v891_v31  ;;  %v888_v43 = vadd.f32 %v873_v42, %v816_v39  ;;  %v748_v13 = vmul.f32 %v740_v12, %v1980_v58  ;;  %v1311_v16 = vld [vmem:[%s2534_s5] sm:$0xff] }
 0x1a1   : > { %995 = vrot.lane.b32.xlu0 %v966_v30, %s1767_s20  ;;  %v1215_v30 = vadd.f32 %v1199_v36, %v1143_v22  ;;  %v1146_v7 = vadd.f32 %v1129_v10, %v1074_v21  ;;  %v750_v54 = vmul.f32 %v740_v12, %v1988_v14  ;;  %v746_v14 = vmul.f32 %v736_v15, %v1976_v60 }
 0x1a2   : > { %v960_v44 = vadd.f32 %v944_v26, %v888_v43 }
 0x1a3   : > { %v1218_v48 = vadd.f32 %v1201_v55, %v1146_v7  ;;  %v665_v24 = vpop.permute.xlu1 %664 }
 0x1a4   : > { %1241 = vrot.lane.b32.xlu1 %v1216_v3, %s1768_s21  ;;  %v675_v1 = vmul.f32 %v665_v24, %v1984_v45  ;;  %v676_v6 = vmul.f32 %v665_v24, %v1986_v53 }
 0x1a5   : > { %987 = vrot.lane.b32.xlu0 %v962_v5, %s1767_s20 }
 0x1a7   : > { %v732_v2 = vpop.permute.xlu1 %731 }
 0x1a8   : > { %993 = vrot.lane.b32.xlu1 %v965_v35, %s1767_s20  ;;  %v742_v3 = vmul.f32 %v732_v2, %v1984_v45  ;;  %v744_v4 = vmul.f32 %v732_v2, %v1998_v29  ;;  %v743_v5 = vmul.f32 %v732_v2, %v1986_v53  ;;  %v1312_v29 = vld [vmem:[%s2534_s5 + $0x8] sm:$0xff]  ;;  %v2319_v35 = vpop.permute.xlu0 %646 }
 0x1a9   : > { %1249 = vrot.lane.b32.xlu0 %v1220_v9, %s1768_s21 }
 0x1ab   : > { %v652_v23 = vpop.permute.xlu1 %651 }
 0x1ac   : > { %989 = vrot.lane.b32.xlu1 %v963_v33, %s1767_s20  ;;  %v660_v37 = vmul.f32 0.0, %v652_v23  ;;  %v662_v46 = vmul.f32 %v652_v23, %v1982_v50  ;;  %v661_v61 = vmul.f32 %v652_v23, %v1980_v58 }
 0x1ad   : > { %981 = vrot.lane.b32.xlu0 %v959_v17, %s1767_s20  ;;  %v600_v17 = vand.u32 127, %v382_v25 }
 0x1af   : > { %v2321_v11 = vpop.permute.xlu1 %641  ;;  %v601_v28 = vadd.s32 128, %v600_v17  ;;  %v606_v36 = vand.u32 15, %v600_v17 }
 0x1b0   : > { %1251 = vrot.lane.b32.xlu1 %v2130_v47, %s1768_s21  ;;  %v1126_v47 = vsel %vm699_vm1, %v2142_v56, %v2136_v62  ;;  %v749_v56 = vmul.f32 %v740_v12, %v1982_v50 }
 0x1b1   : > { %1243 = vrot.lane.b32.xlu0 %v1217_v41, %s1768_s21  ;;  %v1142_v0 = vadd.f32 %v1126_v47, %v1070_v19  ;;  %v613_v40 = vand.u32 15, %v601_v28  ;;  %vm2343_vm5 = vcmp.gt.s32.totalorder %v606_v36, 0  ;;  %vm2357_vm7 = vcmp.lt.s32.totalorder %v606_v36, 15 }
 0x1b3   : > { %v1214_v62 = vadd.f32 %v1198_v57, %v1142_v0  ;;  %vm2335_vm4 = vcmp.gt.s32.totalorder %v613_v40, 0  ;;  %vm2364_vm8 = vcmp.lt.s32.totalorder %v613_v40, 15 }
 0x1b4   : > { %983 = vrot.lane.b32.xlu1 %v960_v44, %s1767_s20  ;;  %s1526_s20 = scalar_lea.hbm %s2539_s10, %s1601_s27 }
 0x1b5   : > { %1239 = vrot.lane.b32.xlu0 %v1215_v30, %s1768_s21 }
 0x1b8   : > { %1245 = vrot.lane.b32.xlu1 %v1218_v48, %s1768_s21 }
 0x1b9   : > { %693 = vrot.lane.b32.xlu0 %v678_v63, %s1764_s12 }
 0x1bc   : > { %1237 = vrot.lane.b32.xlu1 %v1214_v62, %s1768_s21  ;;  %s1514_s21 = scalar_lea.sflag [#allocation4], %s350_s26 }
 0x1bd   : > { %774 = vrot.lane.b32.xlu0 %v749_v56, %s1765_s18 }
 0x1c0   : > { %772 = vrot.lane.b32.xlu1 %v748_v13, %s1765_s18 }
 0x1c1   : > { %687 = vrot.lane.b32.xlu0 %v675_v1, %s1764_s12 }
 0x1c4   : > { %776 = vrot.lane.b32.xlu1 %v750_v54, %s1765_s18 }
 0x1c5   : > { %766 = vrot.lane.b32.xlu0 %v745_v51, %s1765_s18 }
 0x1c8   : > { %689 = vrot.lane.b32.xlu1 %v676_v6, %s1764_s12 }
 0x1c9   : > { %770 = vrot.lane.b32.xlu0 %v747_v59, %s1765_s18 }
 0x1cc   : > { %768 = vrot.lane.b32.xlu1 %v746_v14, %s1765_s18 }
 0x1cd   : > { %760 = vrot.lane.b32.xlu0 %v742_v3, %s1765_s18 }
 0x1d0   : > { %1326 = vperm.xlu1 %1689, %v1313_v27  }
 0x1d1   : > { %764 = vrot.lane.b32.xlu0 %v744_v4, %s1765_s18 }
 0x1d4   : > { %762 = vrot.lane.b32.xlu1 %v743_v5, %s1765_s18  ;;  %s1591_s18 = sshll.u32 %s350_s26, 3 }
 0x1d5   : > { %1353 = vperm.xlu0 %1690, %v1340_v52  }
 0x1d8   : > { %1321 = vperm.xlu1 %1689, %v1312_v29  }
 0x1d9   : > { %1316 = vperm.xlu0 %1690, %v1311_v16  }
 0x1dc   : > { %1348 = vperm.xlu1 %1689, %v1339_v8  }
 0x203   : > { %v696_v9 = vpop.permute.xlu1 %695  ;;  %v698_v31 = vpop.permute.xlu0 %697 }
 0x204   : > { %v2325_v34 = vadd.f32 %v696_v9, %v660_v37  ;;  %v702_v33 = vsel %vm699_vm1, %v696_v9, %v698_v31  ;;  %v2328_v20 = vadd.f32 %v698_v31, %v662_v46  ;;  %v1338_v46 = vld [vmem:[%s2535_s6] sm:$0xff] }
 0x205   : > { %v2330_v18 = vadd.f32 %v702_v33, %v661_v61 }
 0x207   : > { %v992_v38 = vpop.permute.xlu0 %991 }
 0x20a   : > { %v2333_v42 = vpop.permute.xlu1 %691 }
 0x20b   : > { %v986_v39 = vpop.permute.xlu0 %985 }
 0x20e   : > { %v998_v50 = vpop.permute.xlu1 %997 }
 0x20f   : > { %v1236_v58 = vpop.permute.xlu0 %1235 }
 0x212   : > { %v1248_v32 = vpop.permute.xlu1 %1247 }
 0x213   : > { %v996_v41 = vpop.permute.xlu0 %995 }
 0x214   : > { %v1005_v43 = vsel %vm999_vm3, %v996_v41, %v998_v50 }
 0x215   : > { %v1017_v25 = vsel %vm2335_vm4, %v1005_v43, 0.0 }
 0x216   : > { %v1242_v10 = vpop.permute.xlu1 %1241  ;;  %1034 = vrot.lane.b32.xlu0 %v1017_v25, %s1764_s12 }
 0x217   : > { %v988_v22 = vpop.permute.xlu0 %987 }
 0x21a   : > { %v994_v44 = vpop.permute.xlu1 %993 }
 0x21b   : > { %v1004_v55 = vsel %vm999_vm3, %v994_v44, %v996_v41  ;;  %v1250_v30 = vpop.permute.xlu0 %1249 }
 0x21c   : > { %v1016_v7 = vsel %vm2343_vm5, %v1004_v55, 0.0  ;;  %v1258_v62 = vsel %vm1253_vm6, %v1248_v32, %v1250_v30 }
 0x21d   : > { %1032 = vrot.lane.b32.xlu1 %v1016_v7, %s1764_s12  ;;  %v1270_v54 = vsel %vm2357_vm7, %v1258_v62, 0.0  ;;  %v1691_v7 = vld [vmem:[#allocation2 + $0x40] sm:$0xff] }
 0x21e   : > { %v990_v47 = vpop.permute.xlu1 %989 }
 0x21f   : > { %v1002_v19 = vsel %vm999_vm3, %v988_v22, %v990_v47  ;;  %v1003_v48 = vsel %vm999_vm3, %v990_v47, %v992_v38  ;;  %v982_v12 = vpop.permute.xlu0 %981  ;;  %v657_v47 = vmul.f32 %v1691_v7, %v2319_v35 }
 0x220   : > { %v1014_v57 = vsel %vm2343_vm5, %v1002_v19, 0.0  ;;  %v1015_v63 = vsel %vm2335_vm4, %v1003_v48, 0.0 }
 0x221   : > { %1028 = vrot.lane.b32.xlu1 %v1014_v57, %s1764_s12  ;;  %1030 = vrot.lane.b32.xlu0 %v1015_v63, %s1764_s12 }
 0x222   : > { %v1252_v24 = vpop.permute.xlu1 %1251 }
 0x223   : > { %v1259_v13 = vsel %vm1253_vm6, %v1250_v30, %v1252_v24  ;;  %v1244_v1 = vpop.permute.xlu0 %1243 }
 0x224   : > { %v1271_v15 = vsel %vm2364_vm8, %v1259_v13, 0.0  ;;  %v1256_v51 = vsel %vm1253_vm6, %v1242_v10, %v1244_v1 }
 0x225   : > { %1286 = vrot.lane.b32.xlu1 %v1270_v54, %s1764_s12  ;;  %1288 = vrot.lane.b32.xlu0 %v1271_v15, %s1764_s12  ;;  %v1268_v2 = vsel %vm2357_vm7, %v1256_v51, 0.0 }
 0x226   : > { %v984_v59 = vpop.permute.xlu1 %983 }
 0x227   : > { %v1000_v6 = vsel %vm999_vm3, %v982_v12, %v984_v59  ;;  %v1001_v3 = vsel %vm999_vm3, %v984_v59, %v986_v39  ;;  %v1240_v16 = vpop.permute.xlu0 %1239  ;;  %v715_v12 = vadd.f32 %v2333_v42, %v657_v47 }
 0x228   : > { %v1012_v14 = vsel %vm2343_vm5, %v1000_v6, 0.0  ;;  %v1013_v27 = vsel %vm2335_vm4, %v1001_v3, 0.0 }
 0x229   : > { %1024 = vrot.lane.b32.xlu1 %v1012_v14, %s1764_s12  ;;  %1282 = vrot.lane.b32.xlu0 %v1268_v2, %s1764_s12 }
 0x22a   : > { %v1246_v4 = vpop.permute.xlu1 %1245 }
 0x22b   : > { %v1257_v5 = vsel %vm1253_vm6, %v1244_v1, %v1246_v4  ;;  %v694_v9 = vpop.permute.xlu0 %693 }
 0x22c   : > { %v1269_v8 = vsel %vm2364_vm8, %v1257_v5, 0.0 }
 0x22d   : > { %1026 = vrot.lane.b32.xlu1 %v1013_v27, %s1764_s12  ;;  %v658_v27 = vmul.f32 %v2319_v35, %v1974_v49 }
 0x22e   : > { %v1238_v52 = vpop.permute.xlu1 %1237 }
 0x22f   : > { %v1254_v29 = vsel %vm1253_vm6, %v1236_v58, %v1238_v52  ;;  %v1255_v37 = vsel %vm1253_vm6, %v1238_v52, %v1240_v16  ;;  %v775_v31 = vpop.permute.xlu0 %774 }
 0x230   : > { %v1266_v23 = vsel %vm2357_vm7, %v1254_v29, 0.0  ;;  %v1267_v61 = vsel %vm2364_vm8, %v1255_v37, 0.0 }
 0x231   : > { %1284 = vrot.lane.b32.xlu1 %v1269_v8, %s1764_s12  ;;  %1278 = vrot.lane.b32.xlu0 %v1266_v23, %s1764_s12 }
 0x232   : > { %v773_v33 = vpop.permute.xlu1 %772 }
 0x233   : > { %v2402_v17 = vpop.permute.xlu0 %687  ;;  %v800_v19 = vadd.f32 %v773_v33, %v2325_v34  ;;  %v783_v1 = vsel %vm778_vm2, %v773_v33, %v775_v31  ;;  %v659_v34 = vmul.f32 %v2319_v35, %v1976_v60 }
 0x234   : > { %v801_v52 = vadd.f32 %v783_v1, %v2330_v18 }
 0x235   : > { %1280 = vrot.lane.b32.xlu1 %v1267_v61, %s1764_s12  ;;  %1343 = vperm.xlu0 %1690, %v1338_v46   ;;  %v717_v5 = vadd.f32 %v694_v9, %v659_v34  ;;  %s1769_s12 = smov 16  }
 0x236   : > { %v777_v38 = vpop.permute.xlu1 %776 }
 0x237   : > { %v767_v28 = vpop.permute.xlu0 %766  ;;  %v784_v44 = vsel %vm778_vm2, %v775_v31, %v777_v38 }
 0x238   : > { %v802_v48 = vadd.f32 %v784_v44, %v2328_v20  ;;  %v797_v56 = vadd.f32 %v767_v28, %v715_v12  ;;  %v701_v20 = vsel %vm699_vm1, %v2333_v42, %v694_v9 }
 0x239   : > { %v716_v23 = vadd.f32 %v701_v20, %v658_v27 }
 0x23a   : > { %v2404_v39 = vpop.permute.xlu1 %689 }
 0x23b   : > { %v771_v50 = vpop.permute.xlu0 %770  ;;  %v700_v18 = vsel %vm699_vm1, %v2402_v17, %v2404_v39 }
 0x23e   : > { %v769_v40 = vpop.permute.xlu1 %768 }
 0x23f   : > { %v2406_v58 = vpop.permute.xlu0 %760  ;;  %v782_v2 = vsel %vm778_vm2, %v769_v40, %v771_v50  ;;  %v781_v29 = vsel %vm778_vm2, %v767_v28, %v769_v40  ;;  %v655_v50 = vmul.f32 %v2321_v11, %v1984_v45  ;;  %v656_v40 = vmul.f32 %v2321_v11, %v1986_v53 }
 0x240   : > { %v799_v37 = vadd.f32 %v782_v2, %v717_v5  ;;  %v798_v35 = vadd.f32 %v781_v29, %v716_v23  ;;  %v654_v45 = vmul.f32 %v1691_v7, %v2321_v11  ;;  %v1488_v5 = vld [vmem:[%s2537_s8] sm:$0xf] }
 0x241   : > { %v714_v53 = vadd.f32 %v2404_v39, %v656_v40 }
 0x243   : > { %v2410_v26 = vpop.permute.xlu0 %764 }
 0x24b   : > { %v2408_v32 = vpop.permute.xlu1 %1326 }
 0x24f   : > { %v2412_v41 = vpop.permute.xlu1 %762 }
 0x250   : > { %v2414_v43 = vpop.permute.xlu0 %1353  ;;  %v779_v44 = vsel %vm778_vm2, %v2406_v58, %v2412_v41 }
 0x253   : > { %v2416_v25 = vpop.permute.xlu1 %1321 }
 0x254   : > { %v2418_v36 = vpop.permute.xlu0 %1316 }
 0x257   : > { %v2420_v10 = vpop.permute.xlu1 %1348 }
 0x288   : > { %v1035_v22 = vpop.permute.xlu0 %1034 }
 0x289   : > { %v1056_v57 = vadd.f32 %v1035_v22, %v802_v48 }
 0x28f   : > { %v1033_v21 = vpop.permute.xlu1 %1032 }
 0x290   : > { %v1054_v63 = vadd.f32 %v1033_v21, %v800_v19  ;;  %v1038_v60 = vsel %vm699_vm1, %v1033_v21, %v1035_v22  ;;  %v713_v19 = vadd.f32 %v700_v18, %v655_v50 }
 0x291   : > { %v1055_v31 = vadd.f32 %v1038_v60, %v801_v52 }
 0x293   : > { %v1029_v55 = vpop.permute.xlu1 %1028  ;;  %v1031_v30 = vpop.permute.xlu0 %1030 }
 0x294   : > { %v1051_v54 = vadd.f32 %v1029_v55, %v797_v56  ;;  %v1037_v33 = vsel %vm699_vm1, %v1029_v55, %v1031_v30  ;;  %v1053_v9 = vadd.f32 %v1031_v30, %v799_v37  ;;  %v780_v55 = vsel %vm778_vm2, %v2412_v41, %v2410_v26 }
 0x295   : > { %v1052_v22 = vadd.f32 %v1037_v33, %v798_v35  ;;  %v795_v26 = vadd.f32 %v779_v44, %v713_v19  ;;  %v796_v41 = vadd.f32 %v780_v55, %v714_v53 }
 0x297   : > { %v1287_v0 = vpop.permute.xlu1 %1286  ;;  %v1289_v62 = vpop.permute.xlu0 %1288 }
 0x298   : > { %v1308_v24 = vadd.f32 %v1287_v0, %v1054_v63  ;;  %v1310_v13 = vadd.f32 %v1289_v62, %v1056_v57  ;;  %v1292_v46 = vsel %vm699_vm1, %v1287_v0, %v1289_v62  ;;  %v712_v0 = vadd.f32 %v2402_v17, %v654_v45 }
 0x299   : > { %v1309_v38 = vadd.f32 %v1292_v46, %v1055_v31 }
 0x29a   : > { %v1335_v15 = vmul.f32 %v2408_v32, %v1308_v24  ;;  %v1337_v51 = vmul.f32 %v2408_v32, %v1310_v13  ;;  %v794_v39 = vadd.f32 %v2406_v58, %v712_v0 }
 0x29b   : > { %v1025_v59 = vpop.permute.xlu1 %1024  ;;  %v1283_v6 = vpop.permute.xlu0 %1282  ;;  %v1336_v12 = vmul.f32 %v2408_v32, %v1309_v38 }
 0x29c   : > { %v1362_v14 = vadd.f32 %v2414_v43, %v1335_v15  ;;  %v1364_v3 = vadd.f32 %v2414_v43, %v1337_v51  ;;  %v1305_v4 = vadd.f32 %v1283_v6, %v1051_v54  ;;  %v1048_v17 = vadd.f32 %v1025_v59, %v794_v39 }
 0x29d   : > { %v1363_v54 = vadd.f32 %v2414_v43, %v1336_v12 }
 0x29e   : > { %v1371_v42 = vmax.f32 %v1362_v14, 0.0  ;;  %v1373_v16 = vmax.f32 %v1364_v3, 0.0  ;;  %v1332_v8 = vmul.f32 %v2416_v25, %v1305_v4 }
 0x29f   : > { %v1027_v61 = vpop.permute.xlu1 %1026 }
 0x2a0   : > { %v1359_v49 = vadd.f32 %v2420_v10, %v1332_v8  ;;  %1395 = vrot.lane.b32.xlu1 %v1371_v42, %s1769_s12  ;;  %1399 = vrot.lane.b32.xlu0 %v1373_v16, %s1769_s12  ;;  %v1036_v57 = vsel %vm699_vm1, %v1025_v59, %v1027_v61  ;;  %v1050_v32 = vadd.f32 %v1027_v61, %v796_v41 }
 0x2a1   : > { %v1049_v13 = vadd.f32 %v1036_v57, %v795_v26 }
 0x2a2   : > { %v1368_v28 = vmax.f32 %v1359_v49, 0.0 }
 0x2a3   : > { %v1285_v21 = vpop.permute.xlu1 %1284  ;;  %v1279_v56 = vpop.permute.xlu0 %1278 }
 0x2a4   : > { %v1291_v30 = vsel %vm699_vm1, %v1283_v6, %v1285_v21  ;;  %v1307_v47 = vadd.f32 %v1285_v21, %v1053_v9  ;;  %1389 = vrot.lane.b32.xlu0 %v1368_v28, %s1769_s12  ;;  %v1372_v6 = vmax.f32 %v1363_v54, 0.0  ;;  %v365_v9 = vld [vmem:[%s2536_s7] sm:$0xf] }
 0x2a5   : > { %v1306_v48 = vadd.f32 %v1291_v30, %v1052_v22  ;;  %v1692_v30 = vld [vmem:[%s1961_s11] sm:$0xff]  ;;  %s1770_s11 = smov [#allocation3]  }
 0x2a6   : > { %v1334_v63 = vmul.f32 %v2416_v25, %v1307_v47  ;;  %v1504_v47 = vcombine.high %v1692_v30, %v1692_v30  ;;  %s1697_s0 = sshll.u32 %s1770_s11, 4  ;;  %s1698_s0 = int_to_ptr.vmem [resolvable:$false] %s1697_s0 }
 0x2a7   : > { %v1333_v62 = vmul.f32 %v2416_v25, %v1306_v48  ;;  %v1281_v24 = vpop.permute.xlu1 %1280  ;;  %v1302_v25 = vadd.f32 %v1279_v56, %v1048_v17  ;;  %s1699_s17 = scalar_lea.vmem %s1698_s0, 256 }
 0x2a8   : > { %v1361_v11 = vadd.f32 %v2420_v10, %v1334_v63  ;;  %v1290_v7 = vsel %vm699_vm1, %v1279_v56, %v1281_v24  ;;  %v1304_v20 = vadd.f32 %v1281_v24, %v1050_v32 }
 0x2a9   : > { %v1360_v1 = vadd.f32 %v2420_v10, %v1333_v62  ;;  %v1303_v34 = vadd.f32 %v1290_v7, %v1049_v13  ;;  %v1329_v43 = vmul.f32 %v2418_v36, %v1302_v25 }
 0x2aa   : > { %v1370_v15 = vmax.f32 %v1361_v11, 0.0  ;;  %v1331_v58 = vmul.f32 %v2418_v36, %v1304_v20 }
 0x2ab   : > { %v1369_v51 = vmax.f32 %v1360_v1, 0.0  ;;  %v1330_v2 = vmul.f32 %v2418_v36, %v1303_v34  ;;  %v1496_v36 = vld [vmem:[%s2538_s9] sm:$0xf] }
 0x2ac   : > { %1393 = vrot.lane.b32.xlu1 %v1370_v15, %s1769_s12 }
 0x2ad   : > { %1391 = vrot.lane.b32.xlu0 %v1369_v51, %s1769_s12 }
 0x2b0   : > { %1397 = vrot.lane.b32.xlu1 %v1372_v6, %s1769_s12  ;;  %v1344_v10 = vpop.permute.xlu0 %1343 }
 0x2b1   : > { %v1357_v14 = vadd.f32 %v1344_v10, %v1330_v2  ;;  %v1358_v59 = vadd.f32 %v1344_v10, %v1331_v58  ;;  %v1356_v3 = vadd.f32 %v1344_v10, %v1329_v43 }
 0x2b3   : > { %v1366_v4 = vmax.f32 %v1357_v14, 0.0  ;;  %v1367_v27 = vmax.f32 %v1358_v59, 0.0  ;;  %v1365_v52 = vmax.f32 %v1356_v3, 0.0 }
 0x2b5   : > { %1387 = vrot.lane.b32.xlu0 %v1367_v27, %s1769_s12  ;;  %1385 = vrot.lane.b32.xlu1 %v1366_v4, %s1769_s12 }
 0x2b9   : > { %1491 = vperm.xlu0 %1690, %v1488_v5   ;;  %1383 = vrot.lane.b32.xlu1 %v1365_v52, %s1769_s12  ;;  %s352_s12 = scalar_lea.vmem [#allocation3], %s1591_s18 }
 0x2ba   : > { %s1528_s28 = sshll.u32 %s352_s12, 4  ;;  %s1529_s28 = int_to_ptr.vmem [resolvable:$true] %s1528_s28 }
 0x2bb   : > { %s1693_s25 = scalar_lea.vmem %s1529_s28, 128  ;;  %p1700_p0 = scmp.lt.s32.totalorder %s1529_s28, %s1698_s0 }
 0x2bc   : > { %p1694_p11 = scmp.ne.s32.totalorder %s1529_s28, %s1693_s25  ;;  %p1701_p1 = scmp.lt.s32.totalorder %s1699_s17, %s1693_s25 }
 0x2bd   : > { %1499 = vperm.xlu1 %1689, %v1496_v36  }
 0x2be   : > { %p1695_p12 = pnand %p1694_p11, %p1864_p5  ;;  %p1702_p2 = por %p1701_p1, %p1700_p0 }
 0x2c0   : > { %p1696_p13 = pneg %p1695_p12 }
 0x2c2   : > { %p1703_p3 = pnand %p1702_p2, %p1696_p13 }
 0x312   : > { %v1400_v60 = vpop.permute.xlu0 %1399  ;;  %v1396_v29 = vpop.permute.xlu1 %1395 }
 0x316   : > { %v1390_v42 = vpop.permute.xlu0 %1389 }
 0x31e   : > { %v1394_v16 = vpop.permute.xlu1 %1393 }
 0x31f   : > { %v1392_v8 = vpop.permute.xlu0 %1391 }
 0x320   : > { %v1405_v61 = vsel %vm1401_vm9, %v1392_v8, %v1394_v16  ;;  %v1404_v31 = vsel %vm1401_vm9, %v1390_v42, %v1392_v8 }
 0x322   : > { %v1398_v23 = vpop.permute.xlu1 %1397 }
 0x323   : > { %v1407_v37 = vsel %vm1401_vm9, %v1398_v23, %v1400_v60  ;;  %v1406_v46 = vsel %vm1401_vm9, %v1396_v29, %v1398_v23 }
 0x324   : > { %1443 = vmatprep.subr.mxu0 %v1407_v37 }
 0x325   : > { %1444 = vmatpush1.msra.mxu0 %v1406_v46 }
 0x326   : > { %1445 = vmatprep.subr.mxu0 %v1405_v61 }
 0x327   : > { %1446 = vmatpush1.msra.mxu0 %v1404_v31  ;;  %v1388_v33 = vpop.permute.xlu0 %1387  ;;  %v1386_v49 = vpop.permute.xlu1 %1385 }
 0x328   : > { %v1403_v35 = vsel %vm1401_vm9, %v1386_v49, %v1388_v33 }
 0x329   : > { %1447 = vmatprep.subr.mxu0 %v1403_v35 }
 0x32b   : > { %v1384_v18 = vpop.permute.xlu1 %1383 }
 0x32c   : > { %v1402_v38 = vsel %vm1401_vm9, %v1384_v18, %v1386_v49 }
 0x32d   : > { %1448 = vmatpush1.msra.mxu0 %v1402_v38 }
 0x32e   : > { %1594 = vmatmul.mubr.msk.f32.vlgmr.msra.gmra.mxu0 %vm589_vm0, %v365_v9 }
 0x334   : > { %v1492_v28 = vpop.permute.xlu0 %1491 }
 0x338   : > { %v1500_v22 = vpop.permute.xlu1 %1499 }
 0x3ee   : > { %v1483_v50 = vpop.f32.mrf.mxu0 }
 0x3ef   : > { %v1494_v40 = vmul.f32 %v1492_v28, %v1483_v50 }
 0x3f0   : > { %v1485_v21 = vpop.f32.mrf.mxu0 }
 0x3f1   : > { %v1502_v44 = vadd.f32 %v1500_v22, %v1494_v40  ;;  %v1495_v55 = vmul.f32 %v1492_v28, %v1485_v21 }
 0x3f3   : > { %v1503_v45 = vadd.f32 %v1500_v22, %v1495_v55  ;;  %v1506_v19 = vadd.f32 %v1692_v30, %v1502_v44 }
 0x3f5   : > { %v1507_v53 = vadd.f32 %v1504_v47, %v1503_v45 }
 0x3f7   : > { %v1510_v48 = vcombine.low %v1506_v19, %v1507_v53 }
 0x3f9   : > { %1512 = vst [vmem:[%s352_s12] sm:$0xff] %v1510_v48 }
 0x3fa   : > { %1706 = shalt.err (!%p1703_p3)
}
 0x3fb   : > { %s1707_s18 = scalar_lea.hbm %s1526_s20, 128  ;;  %s1711_s12 = scalar_lea.hbm %s2539_s10, 256 }
 0x3fc   : > { %p1708_p4 = scmp.ne.s32.totalorder %s1526_s20, %s1707_s18  ;;  %p1712_p9 = scmp.lt.s32.totalorder %s1526_s20, %s2539_s10 }
 0x3fd   : > { %p1713_p10 = scmp.lt.s32.totalorder %s1711_s12, %s1707_s18 }
 0x3fe   : > { %p1709_p7 = pnand %p1708_p4, %p1864_p5 }
 0x3ff   : > { %p1714_p11 = por %p1713_p10, %p1712_p9 }
 0x400   : > { %p1710_p8 = pneg %p1709_p7 }
 0x402   : > { %p1715_p12 = pnand %p1714_p11, %p1710_p8 }
 0x404   : > { %1718 = shalt.err (!%p1715_p12)
}
 0x405   : > { %1602 = dma.vmem_to_hbm [thread:$0]  (%p1864_p5), %s1529_s28, 128, %s1526_s20, %s1514_s21  }
 0x406 PF: > { %p1608_p13 = scmp.ge.s32.totalorder %s1753_s16, 2  ;;  %s1540_s0 = sand.u32 1, %s1741_s13  }
 0x407   : > { %s1541_s25 = scalar_lea.sflag [#allocation4], %s1540_s0 }
 0x408   : > { %p1605_p0 = pnand %p1608_p13, %p1868_p6 }
 0x40a   : > { %p1606_p1 = pneg %p1605_p0 }
 0x40c   : > { %1736 = dma.done.wait (%p1606_p1), %s1541_s25, 128  }
 0x40d   : > { %1738 = vsyncadd (%p1606_p1), %s1541_s25, 4294967168  ;;  %p20_p2 = scmp.ge.s32.totalorder %s1851_s19, 4   ;;  %s2552_s13 = smov %s1745_s14 }
 0x40e   : > { %s2553_s14 = smov %s1749_s15  ;;  %s2554_s15 = smov %s1862_s22 }
 0x40f   : > { %s2555_s16 = smov %s1851_s19  ;;  %22 = sbr.rel (!%p20_p2) target bundleno = 5 (0x5), region = 95 }
 0x414   :  { %1546 = vsyncpa [#allocation4], 1 }
 0x415   :  { %1548 = vsyncpa [#allocation4 + $0x1], 1 }

</bundles_post_ra>
